<compile_context>
chip_gen: v7x
topology: tpu7x:2x2x1
jax: 0.10.0
libtpu: 0.0.40
codegen_flags: <defaults>
</compile_context>

<pallas_src>
import math
import functools

import jax
import jax.numpy as jnp
from jax.experimental import pallas as pl
from jax.experimental.pallas import tpu as pltpu


def _pick_tile(n, target):
    """Largest divisor of n that is <= target (prefer multiples of 8)."""
    if n <= target:
        return n
    fallback = None
    for t in range(min(target, n), 0, -1):
        if n % t == 0:
            if t % 8 == 0:
                return t
            if fallback is None:
                fallback = t
    return fallback if fallback is not None else n


def _attention_kernel(q_ref, k_ref, v_ref,
                      wq_ref, bq_ref, wk_ref, bk_ref, wv_ref, bv_ref,
                      wo_ref, bo_ref,
                      o_ref,
                      qh_sc, m_sc, l_sc, acc_sc,
                      *, num_heads, c_per_head):
    H, c = num_heads, c_per_head
    ki = pl.program_id(2)

    def split_heads(x):
        # (N, H*c) -> (H, N, c): static lane slices + leading-axis stack
        # (once per tile; avoids unsupported in-kernel lane reshapes).
        return jnp.stack([x[:, h * c:(h + 1) * c] for h in range(H)], axis=0)

    @pl.when(ki == 0)
    def _init():
        # Dense lane-wide q projection; softmax scale pre-folded into wq/bq.
        qp = jnp.dot(q_ref[0], wq_ref[...],
                     preferred_element_type=jnp.float32) + bq_ref[...]   # (TQ, Ei) f32
        qh_sc[...] = split_heads(qp).astype(jnp.bfloat16)                # (H, TQ, c)
        m_sc[...] = jnp.full(m_sc.shape, -jnp.inf, jnp.float32)
        l_sc[...] = jnp.zeros(l_sc.shape, jnp.float32)
        acc_sc[...] = jnp.zeros(acc_sc.shape, jnp.float32)

    # Dense k / v projections for this key/value tile (Ei output lanes).
    kp = jnp.dot(k_ref[0], wk_ref[...],
                 preferred_element_type=jnp.float32) + bk_ref[...]       # (TK, Ei) f32
    vp = jnp.dot(v_ref[0], wv_ref[...],
                 preferred_element_type=jnp.float32) + bv_ref[...]       # (TK, Ei) f32
    kh = split_heads(kp).astype(jnp.bfloat16)                            # (H, TK, c)
    vh = split_heads(vp).astype(jnp.bfloat16)                            # (H, TK, c)

    # Scores (scale already folded into q), batched over heads, f32 accumulate.
    s = jnp.einsum('hqc,hkc->hqk', qh_sc[...], kh,
                   preferred_element_type=jnp.float32)                   # (H, TQ, TK)

    # Flash-style online softmax across the Nk grid axis.
    m_prev = m_sc[...]
    m_new = jnp.maximum(m_prev, jnp.max(s, axis=-1, keepdims=True))
    alpha = jnp.exp(m_prev - m_new)
    p = jnp.exp(s - m_new)
    # TODO(synk): on v6e/v7x compute p in bf16 if profiling shows the single EUP
    # port saturating (keep m/l in f32); not done unconditionally (v5e has no
    # bf16 EUP).
    l_sc[...] = alpha * l_sc[...] + jnp.sum(p, axis=-1, keepdims=True)
    acc_sc[...] = alpha * acc_sc[...] + jnp.einsum(
        'hqk,hkc->hqc', p.astype(jnp.bfloat16), vh,
        preferred_element_type=jnp.float32)
    m_sc[...] = m_new

    @pl.when(ki == pl.num_programs(2) - 1)
    def _finalize():
        ctx = acc_sc[...] * pl.reciprocal(l_sc[...], approx=True)        # (H, TQ, c)
        # Recombine heads (one lane concat per q tile) and run the output
        # projection as a single K = internal_dim matmul: the MXU performs the
        # head sum for free (same result as a dot_general contracting (h, c)).
        ctx_flat = jnp.concatenate([ctx[h] for h in range(H)], axis=-1)  # (TQ, Ei)
        out = jnp.dot(ctx_flat.astype(jnp.bfloat16), wo_ref[...],
                      preferred_element_type=jnp.float32) + bo_ref[...]  # (TQ, E)
        o_ref[0] = out.astype(o_ref.dtype)


def attention_forward(q, k, v, params, num_heads, *, tq_target=256, tk_target=512):
    """q: (B, Nq, E); k, v: (B, Nk, E). Returns (B, Nq, E)."""
    B, Nq, E = q.shape
    _, Nk, _ = k.shape
    wq, bq, wk, bk, wv, bv, wo, bo = params
    Ei = wq.shape[0]                     # internal_dim
    assert Ei % num_heads == 0
    H = num_heads
    c = Ei // H
    scale = 1.0 / math.sqrt(c)
    out_dtype = q.dtype

    # Cast activations to bf16 once in the wrapper: halves activation DMA bytes
    # and removes per-step in-kernel full-block casts (largest relative win on
    # v5e's weaker HBM, helps all generations).
    q_b = q.astype(jnp.bfloat16)
    k_b = k.astype(jnp.bfloat16)
    v_b = v.astype(jnp.bfloat16)

    # One-time weight prep: transpose nn.Linear (out, in) -> (in, out), fold the
    # 1/sqrt(c) softmax scale into the q projection (weight AND bias), cast
    # weights to bf16 for MXU peak; biases stay f32 (added post-accumulation).
    wq_t = (wq.T * scale).astype(jnp.bfloat16)           # (E, Ei), scaled
    wk_t = wk.T.astype(jnp.bfloat16)                     # (E, Ei)
    wv_t = wv.T.astype(jnp.bfloat16)                     # (E, Ei)
    wo_t = wo.T.astype(jnp.bfloat16)                     # (Ei, E)
    bq_s = (bq * scale).reshape(1, Ei).astype(jnp.float32)
    bk_s = bk.reshape(1, Ei).astype(jnp.float32)
    bv_s = bv.reshape(1, Ei).astype(jnp.float32)
    bo_s = bo.reshape(1, E).astype(jnp.float32)

    # Flash-style tiling. Re-sweep targets per generation: ~(256, 512) for v7x
    # (64 MiB VMEM), up to ~2x larger on v6e (128 MiB).
    TQ = _pick_tile(Nq, tq_target)
    TK = _pick_tile(Nk, tk_target)
    grid = (B, Nq // TQ, Nk // TK)

    const2 = lambda b, qi, ki: (0, 0)

    flops = (2 * B * Nq * E * Ei          # q projection
             + 4 * B * Nk * E * Ei        # k + v projections
             + 4 * B * Nq * Nk * Ei       # QK^T + PV
             + 2 * B * Nq * Ei * E)       # output projection
    transcendentals = B * H * Nq * Nk
    bytes_accessed = (2 * B * (Nq + 2 * Nk) * E      # bf16 activations in
                      + 4 * B * Nq * E               # f32 output
                      + 2 * (3 * E * Ei + Ei * E)    # bf16 weights
                      + 4 * (3 * Ei + E))            # f32 biases

    kernel = functools.partial(_attention_kernel, num_heads=H, c_per_head=c)

    return pl.pallas_call(
        kernel,
        out_shape=jax.ShapeDtypeStruct((B, Nq, E), out_dtype),
        grid_spec=pltpu.PrefetchScalarGridSpec(
            num_scalar_prefetch=0,
            grid=grid,
            in_specs=[
                pl.BlockSpec((1, TQ, E), lambda b, qi, ki: (b, qi, 0)),   # q
                pl.BlockSpec((1, TK, E), lambda b, qi, ki: (b, ki, 0)),   # k
                pl.BlockSpec((1, TK, E), lambda b, qi, ki: (b, ki, 0)),   # v
                pl.BlockSpec((E, Ei), const2),   # wq (scale folded)
                pl.BlockSpec((1, Ei), const2),   # bq (scale folded)
                pl.BlockSpec((E, Ei), const2),   # wk
                pl.BlockSpec((1, Ei), const2),   # bk
                pl.BlockSpec((E, Ei), const2),   # wv
                pl.BlockSpec((1, Ei), const2),   # bv
                pl.BlockSpec((Ei, E), const2),   # wo
                pl.BlockSpec((1, E), const2),    # bo
            ],
            out_specs=pl.BlockSpec((1, TQ, E), lambda b, qi, ki: (b, qi, 0)),
            scratch_shapes=[
                pltpu.VMEM((H, TQ, c), jnp.bfloat16),   # projected q (head-split)
                pltpu.VMEM((H, TQ, 1), jnp.float32),    # running max
                pltpu.VMEM((H, TQ, 1), jnp.float32),    # running denominator
                pltpu.VMEM((H, TQ, c), jnp.float32),    # output accumulator
            ],
        ),
        compiler_params=pltpu.CompilerParams(
            dimension_semantics=("parallel", "parallel", "arbitrary"),
            vmem_limit_bytes=64 * 1024 * 1024,
        ),
        cost_estimate=pl.CostEstimate(
            flops=flops, transcendentals=transcendentals,
            bytes_accessed=bytes_accessed),
    )(q_b, k_b, v_b, wq_t, bq_s, wk_t, bk_s, wv_t, bv_s, wo_t, bo_s)


def attention_reference(q, k, v, params, num_heads):
    """Pure-JAX f32 reference mirroring the PyTorch forward exactly."""
    wq, bq, wk, bk, wv, bv, wo, bo = params
    B, Nq, E = q.shape
    Ei = wq.shape[0]
    c = Ei // num_heads

    def sep(x):
        b, n, _ = x.shape
        return x.reshape(b, n, num_heads, c).transpose(0, 2, 1, 3)   # (B, H, N, c)

    qp = sep(q @ wq.T + bq)
    kp = sep(k @ wk.T + bk)
    vp = sep(v @ wv.T + bv)
    attn = jnp.einsum('bhqc,bhkc->bhqk', qp, kp) / math.sqrt(c)
    attn = jax.nn.softmax(attn.astype(jnp.float32), axis=-1).astype(q.dtype)
    out = jnp.einsum('bhqk,bhkc->bhqc', attn, vp)
    out = out.transpose(0, 2, 1, 3).reshape(B, Nq, Ei)
    return out @ wo.T + bo


def init_params(key, embedding_dim, internal_dim):
    ks = jax.random.split(key, 8)
    s_in = 1.0 / math.sqrt(embedding_dim)
    s_int = 1.0 / math.sqrt(internal_dim)
    wq = jax.random.uniform(ks[0], (internal_dim, embedding_dim), jnp.float32, -s_in, s_in)
    bq = jax.random.uniform(ks[1], (internal_dim,), jnp.float32, -s_in, s_in)
    wk = jax.random.uniform(ks[2], (internal_dim, embedding_dim), jnp.float32, -s_in, s_in)
    bk = jax.random.uniform(ks[3], (internal_dim,), jnp.float32, -s_in, s_in)
    wv = jax.random.uniform(ks[4], (internal_dim, embedding_dim), jnp.float32, -s_in, s_in)
    bv = jax.random.uniform(ks[5], (internal_dim,), jnp.float32, -s_in, s_in)
    wo = jax.random.uniform(ks[6], (embedding_dim, internal_dim), jnp.float32, -s_int, s_int)
    bo = jax.random.uniform(ks[7], (embedding_dim,), jnp.float32, -s_int, s_int)
    return (wq, bq, wk, bk, wv, bv, wo, bo)


if __name__ == "__main__":
    # Small shapes consistent with the module: batch=2, seq=8, embedding_dim=32,
    # num_heads=4, downsample_rate=2  => internal_dim=16, c_per_head=4.
    B, Nq, Nk = 2, 8, 8
    embedding_dim = 32
    num_heads = 4
    downsample_rate = 2
    internal_dim = embedding_dim // downsample_rate

    key = jax.random.PRNGKey(0)
    kq, kk, kv, kp = jax.random.split(key, 4)
    q = jax.random.normal(kq, (B, Nq, embedding_dim), jnp.float32)
    k = jax.random.normal(kk, (B, Nk, embedding_dim), jnp.float32)
    v = jax.random.normal(kv, (B, Nk, embedding_dim), jnp.float32)
    params = init_params(kp, embedding_dim, internal_dim)

    out = attention_forward(q, k, v, params, num_heads)
    out = jax.block_until_ready(out)

    ref = attention_reference(q, k, v, params, num_heads)
    assert out.shape == (B, Nq, embedding_dim)
    # Kernel runs bf16 matmuls (f32 accumulation) with an approx reciprocal in
    # the softmax finalize, so allow a bf16-level tolerance vs the f32 reference.
    max_err = jnp.max(jnp.abs(out - ref))
    assert jnp.allclose(out, ref, atol=3e-2, rtol=3e-2), f"max err {max_err}"

    # TODO(synk): the optional kd_targets[target_name] = attn side output
    # (mutable Python dict of attention maps) is not expressible here; with the
    # flash-tiled softmax the full attention matrix is never materialized, so a
    # dedicated non-flash variant with a second output would be needed.
    print("KERNEL_OK")
</pallas_src>

<mosaic_0001>
module attributes {stable_mosaic.version = 11 : i64} {
  func.func @_attention_kernel(%arg0: i32, %arg1: i32, %arg2: i32, %arg3: memref<1x8x32xbf16, #tpu.memory_space<vmem>>, %arg4: memref<1x8x32xbf16, #tpu.memory_space<vmem>>, %arg5: memref<1x8x32xbf16, #tpu.memory_space<vmem>>, %arg6: memref<32x16xbf16, #tpu.memory_space<vmem>>, %arg7: memref<1x16xf32, #tpu.memory_space<vmem>>, %arg8: memref<32x16xbf16, #tpu.memory_space<vmem>>, %arg9: memref<1x16xf32, #tpu.memory_space<vmem>>, %arg10: memref<32x16xbf16, #tpu.memory_space<vmem>>, %arg11: memref<1x16xf32, #tpu.memory_space<vmem>>, %arg12: memref<16x32xbf16, #tpu.memory_space<vmem>>, %arg13: memref<1x32xf32, #tpu.memory_space<vmem>>, %arg14: memref<1x8x32xf32, #tpu.memory_space<vmem>>, %arg15: memref<4x8x4xbf16, #tpu.memory_space<vmem>>, %arg16: memref<4x8x1xf32, #tpu.memory_space<vmem>>, %arg17: memref<4x8x1xf32, #tpu.memory_space<vmem>>, %arg18: memref<4x8x4xf32, #tpu.memory_space<vmem>>) attributes {dimension_semantics = [#tpu.dimension_semantics<parallel>, #tpu.dimension_semantics<parallel>, #tpu.dimension_semantics<arbitrary>], iteration_bounds = array<i64: 2, 1, 1>, scalar_prefetch = 0 : i64, scratch_operands = 4 : i64, tpu.core_type = #tpu.core_type<tc>, window_params = [{transform_indices = @transform_0, window_bounds = array<i64: 1, 8, 32>}, {transform_indices = @transform_1, window_bounds = array<i64: 1, 8, 32>}, {transform_indices = @transform_2, window_bounds = array<i64: 1, 8, 32>}, {pipeline_mode = #tpu.pipeline_mode<synchronous>, transform_indices = @transform_3, window_bounds = array<i64: 32, 16>}, {pipeline_mode = #tpu.pipeline_mode<synchronous>, transform_indices = @transform_4, window_bounds = array<i64: 1, 16>}, {pipeline_mode = #tpu.pipeline_mode<synchronous>, transform_indices = @transform_5, window_bounds = array<i64: 32, 16>}, {pipeline_mode = #tpu.pipeline_mode<synchronous>, transform_indices = @transform_6, window_bounds = array<i64: 1, 16>}, {pipeline_mode = #tpu.pipeline_mode<synchronous>, transform_indices = @transform_7, window_bounds = array<i64: 32, 16>}, {pipeline_mode = #tpu.pipeline_mode<synchronous>, transform_indices = @transform_8, window_bounds = array<i64: 1, 16>}, {pipeline_mode = #tpu.pipeline_mode<synchronous>, transform_indices = @transform_9, window_bounds = array<i64: 16, 32>}, {pipeline_mode = #tpu.pipeline_mode<synchronous>, transform_indices = @transform_10, window_bounds = array<i64: 1, 32>}, {transform_indices = @transform_11, window_bounds = array<i64: 1, 8, 32>}]} {
    %c0_i32 = arith.constant 0 : i32
    %0 = arith.cmpi eq, %arg2, %c0_i32 : i32
    %1 = arith.extui %0 : i1 to i32
    %c0_i32_0 = arith.constant 0 : i32
    %2 = arith.cmpi ne, %1, %c0_i32_0 : i32
    scf.if %2 {
      %c0_42 = arith.constant 0 : index
      %c0_43 = arith.constant 0 : index
      %c0_44 = arith.constant 0 : index
      %65 = vector.load %arg3[%c0_42, %c0_43, %c0_44] : memref<1x8x32xbf16, #tpu.memory_space<vmem>>, vector<1x8x32xbf16>
      %66 = vector.shape_cast %65 : vector<1x8x32xbf16> to vector<8x32xbf16>
      %c0_45 = arith.constant 0 : index
      %c0_46 = arith.constant 0 : index
      %67 = vector.load %arg6[%c0_45, %c0_46] : memref<32x16xbf16, #tpu.memory_space<vmem>>, vector<32x16xbf16>
      %cst_47 = arith.constant dense<0.000000e+00> : vector<8x16xf32>
      %68 = tpu.matmul %66, %67, %cst_47 {dimension_numbers = #tpu.dot_dimension_numbers<[1], [0], [0], [1], [0, 0, 1, 1], [], []>} : vector<8x32xbf16>, vector<32x16xbf16>, vector<8x16xf32> -> vector<8x16xf32>
      %c0_48 = arith.constant 0 : index
      %c0_49 = arith.constant 0 : index
      %69 = vector.load %arg7[%c0_48, %c0_49] : memref<1x16xf32, #tpu.memory_space<vmem>>, vector<1x16xf32>
      %70 = vector.broadcast %69 : vector<1x16xf32> to vector<8x16xf32>
      %71 = arith.addf %68, %70 : vector<8x16xf32>
      %72 = vector.extract_strided_slice %71 {offsets = [0, 0], sizes = [8, 4], strides = [1, 1]} : vector<8x16xf32> to vector<8x4xf32>
      %73 = vector.extract_strided_slice %71 {offsets = [0, 4], sizes = [8, 4], strides = [1, 1]} : vector<8x16xf32> to vector<8x4xf32>
      %74 = vector.extract_strided_slice %71 {offsets = [0, 8], sizes = [8, 4], strides = [1, 1]} : vector<8x16xf32> to vector<8x4xf32>
      %75 = vector.extract_strided_slice %71 {offsets = [0, 12], sizes = [8, 4], strides = [1, 1]} : vector<8x16xf32> to vector<8x4xf32>
      %76 = vector.shape_cast %72 : vector<8x4xf32> to vector<1x8x4xf32>
      %77 = vector.shape_cast %73 : vector<8x4xf32> to vector<1x8x4xf32>
      %78 = vector.shape_cast %74 : vector<8x4xf32> to vector<1x8x4xf32>
      %79 = vector.shape_cast %75 : vector<8x4xf32> to vector<1x8x4xf32>
      %80 = tpu.concatenate %76, %77, %78, %79 in 0 : vector<1x8x4xf32>, vector<1x8x4xf32>, vector<1x8x4xf32>, vector<1x8x4xf32> -> vector<4x8x4xf32>
      %81 = arith.truncf %80 : vector<4x8x4xf32> to vector<4x8x4xbf16>
      %c0_50 = arith.constant 0 : index
      %c0_51 = arith.constant 0 : index
      %c0_52 = arith.constant 0 : index
      %82 = vector.load %arg15[%c0_50, %c0_51, %c0_52] : memref<4x8x4xbf16, #tpu.memory_space<vmem>>, vector<4x8x4xbf16>
      tpu.vector_store %arg15[%c0_50, %c0_51, %c0_52], %81 {strides = array<i32>} : memref<4x8x4xbf16, #tpu.memory_space<vmem>>, vector<4x8x4xbf16>,
      %cst_53 = arith.constant 0xFF800000 : f32
      %83 = vector.broadcast %cst_53 : f32 to vector<4x8x1xf32>
      %c0_54 = arith.constant 0 : index
      %c0_55 = arith.constant 0 : index
      %c0_56 = arith.constant 0 : index
      %84 = vector.load %arg16[%c0_54, %c0_55, %c0_56] : memref<4x8x1xf32, #tpu.memory_space<vmem>>, vector<4x8x1xf32>
      tpu.vector_store %arg16[%c0_54, %c0_55, %c0_56], %83 {strides = array<i32>} : memref<4x8x1xf32, #tpu.memory_space<vmem>>, vector<4x8x1xf32>,
      %cst_57 = arith.constant 0.000000e+00 : f32
      %85 = vector.broadcast %cst_57 : f32 to vector<4x8x1xf32>
      %c0_58 = arith.constant 0 : index
      %c0_59 = arith.constant 0 : index
      %c0_60 = arith.constant 0 : index
      %86 = vector.load %arg17[%c0_58, %c0_59, %c0_60] : memref<4x8x1xf32, #tpu.memory_space<vmem>>, vector<4x8x1xf32>
      tpu.vector_store %arg17[%c0_58, %c0_59, %c0_60], %85 {strides = array<i32>} : memref<4x8x1xf32, #tpu.memory_space<vmem>>, vector<4x8x1xf32>,
      %cst_61 = arith.constant 0.000000e+00 : f32
      %87 = vector.broadcast %cst_61 : f32 to vector<4x8x4xf32>
      %c0_62 = arith.constant 0 : index
      %c0_63 = arith.constant 0 : index
      %c0_64 = arith.constant 0 : index
      %88 = vector.load %arg18[%c0_62, %c0_63, %c0_64] : memref<4x8x4xf32, #tpu.memory_space<vmem>>, vector<4x8x4xf32>
      tpu.vector_store %arg18[%c0_62, %c0_63, %c0_64], %87 {strides = array<i32>} : memref<4x8x4xf32, #tpu.memory_space<vmem>>, vector<4x8x4xf32>,
    } else {
    }
    %c0 = arith.constant 0 : index
    %c0_1 = arith.constant 0 : index
    %c0_2 = arith.constant 0 : index
    %3 = vector.load %arg4[%c0, %c0_1, %c0_2] : memref<1x8x32xbf16, #tpu.memory_space<vmem>>, vector<1x8x32xbf16>
    %4 = vector.shape_cast %3 : vector<1x8x32xbf16> to vector<8x32xbf16>
    %c0_3 = arith.constant 0 : index
    %c0_4 = arith.constant 0 : index
    %5 = vector.load %arg8[%c0_3, %c0_4] : memref<32x16xbf16, #tpu.memory_space<vmem>>, vector<32x16xbf16>
    %cst = arith.constant dense<0.000000e+00> : vector<8x16xf32>
    %6 = tpu.matmul %4, %5, %cst {dimension_numbers = #tpu.dot_dimension_numbers<[1], [0], [0], [1], [0, 0, 1, 1], [], []>} : vector<8x32xbf16>, vector<32x16xbf16>, vector<8x16xf32> -> vector<8x16xf32>
    %c0_5 = arith.constant 0 : index
    %c0_6 = arith.constant 0 : index
    %7 = vector.load %arg9[%c0_5, %c0_6] : memref<1x16xf32, #tpu.memory_space<vmem>>, vector<1x16xf32>
    %8 = vector.broadcast %7 : vector<1x16xf32> to vector<8x16xf32>
    %9 = arith.addf %6, %8 : vector<8x16xf32>
    %c0_7 = arith.constant 0 : index
    %c0_8 = arith.constant 0 : index
    %c0_9 = arith.constant 0 : index
    %10 = vector.load %arg5[%c0_7, %c0_8, %c0_9] : memref<1x8x32xbf16, #tpu.memory_space<vmem>>, vector<1x8x32xbf16>
    %11 = vector.shape_cast %10 : vector<1x8x32xbf16> to vector<8x32xbf16>
    %c0_10 = arith.constant 0 : index
    %c0_11 = arith.constant 0 : index
    %12 = vector.load %arg10[%c0_10, %c0_11] : memref<32x16xbf16, #tpu.memory_space<vmem>>, vector<32x16xbf16>
    %cst_12 = arith.constant dense<0.000000e+00> : vector<8x16xf32>
    %13 = tpu.matmul %11, %12, %cst_12 {dimension_numbers = #tpu.dot_dimension_numbers<[1], [0], [0], [1], [0, 0, 1, 1], [], []>} : vector<8x32xbf16>, vector<32x16xbf16>, vector<8x16xf32> -> vector<8x16xf32>
    %c0_13 = arith.constant 0 : index
    %c0_14 = arith.constant 0 : index
    %14 = vector.load %arg11[%c0_13, %c0_14] : memref<1x16xf32, #tpu.memory_space<vmem>>, vector<1x16xf32>
    %15 = vector.broadcast %14 : vector<1x16xf32> to vector<8x16xf32>
    %16 = arith.addf %13, %15 : vector<8x16xf32>
    %17 = vector.extract_strided_slice %9 {offsets = [0, 0], sizes = [8, 4], strides = [1, 1]} : vector<8x16xf32> to vector<8x4xf32>
    %18 = vector.extract_strided_slice %9 {offsets = [0, 4], sizes = [8, 4], strides = [1, 1]} : vector<8x16xf32> to vector<8x4xf32>
    %19 = vector.extract_strided_slice %9 {offsets = [0, 8], sizes = [8, 4], strides = [1, 1]} : vector<8x16xf32> to vector<8x4xf32>
    %20 = vector.extract_strided_slice %9 {offsets = [0, 12], sizes = [8, 4], strides = [1, 1]} : vector<8x16xf32> to vector<8x4xf32>
    %21 = vector.shape_cast %17 : vector<8x4xf32> to vector<1x8x4xf32>
    %22 = vector.shape_cast %18 : vector<8x4xf32> to vector<1x8x4xf32>
    %23 = vector.shape_cast %19 : vector<8x4xf32> to vector<1x8x4xf32>
    %24 = vector.shape_cast %20 : vector<8x4xf32> to vector<1x8x4xf32>
    %25 = tpu.concatenate %21, %22, %23, %24 in 0 : vector<1x8x4xf32>, vector<1x8x4xf32>, vector<1x8x4xf32>, vector<1x8x4xf32> -> vector<4x8x4xf32>
    %26 = arith.truncf %25 : vector<4x8x4xf32> to vector<4x8x4xbf16>
    %27 = vector.extract_strided_slice %16 {offsets = [0, 0], sizes = [8, 4], strides = [1, 1]} : vector<8x16xf32> to vector<8x4xf32>
    %28 = vector.extract_strided_slice %16 {offsets = [0, 4], sizes = [8, 4], strides = [1, 1]} : vector<8x16xf32> to vector<8x4xf32>
    %29 = vector.extract_strided_slice %16 {offsets = [0, 8], sizes = [8, 4], strides = [1, 1]} : vector<8x16xf32> to vector<8x4xf32>
    %30 = vector.extract_strided_slice %16 {offsets = [0, 12], sizes = [8, 4], strides = [1, 1]} : vector<8x16xf32> to vector<8x4xf32>
    %31 = vector.shape_cast %27 : vector<8x4xf32> to vector<1x8x4xf32>
    %32 = vector.shape_cast %28 : vector<8x4xf32> to vector<1x8x4xf32>
    %33 = vector.shape_cast %29 : vector<8x4xf32> to vector<1x8x4xf32>
    %34 = vector.shape_cast %30 : vector<8x4xf32> to vector<1x8x4xf32>
    %35 = tpu.concatenate %31, %32, %33, %34 in 0 : vector<1x8x4xf32>, vector<1x8x4xf32>, vector<1x8x4xf32>, vector<1x8x4xf32> -> vector<4x8x4xf32>
    %36 = arith.truncf %35 : vector<4x8x4xf32> to vector<4x8x4xbf16>
    %c0_15 = arith.constant 0 : index
    %c0_16 = arith.constant 0 : index
    %c0_17 = arith.constant 0 : index
    %37 = vector.load %arg15[%c0_15, %c0_16, %c0_17] : memref<4x8x4xbf16, #tpu.memory_space<vmem>>, vector<4x8x4xbf16>
    "tpu.trace_start"() <{level = 10 : i32, message = "hqc,hkc->hqk"}> : () -> ()
    %cst_18 = arith.constant dense<0.000000e+00> : vector<4x8x8xf32>
    %38 = tpu.matmul %37, %26, %cst_18 {dimension_numbers = #tpu.dot_dimension_numbers<[2], [2], [1], [1], [0, 0, 0, 1, 1, 1], [0], [0]>} : vector<4x8x4xbf16>, vector<4x8x4xbf16>, vector<4x8x8xf32> -> vector<4x8x8xf32>
    "tpu.trace_stop"() : () -> ()
    %c0_19 = arith.constant 0 : index
    %c0_20 = arith.constant 0 : index
    %c0_21 = arith.constant 0 : index
    %39 = vector.load %arg16[%c0_19, %c0_20, %c0_21] : memref<4x8x1xf32, #tpu.memory_space<vmem>>, vector<4x8x1xf32>
    %cst_22 = arith.constant dense<0xFF800000> : vector<4x8xf32>
    %40 = vector.multi_reduction <maximumf>, %38, %cst_22 [2] : vector<4x8x8xf32> to vector<4x8xf32>
    %41 = vector.shape_cast %40 : vector<4x8xf32> to vector<4x8x1xf32>
    %42 = arith.maximumf %39, %41 : vector<4x8x1xf32>
    %43 = arith.subf %39, %42 : vector<4x8x1xf32>
    %44 = math.exp %43 : vector<4x8x1xf32>
    %45 = vector.broadcast %42 : vector<4x8x1xf32> to vector<4x8x8xf32>
    %46 = arith.subf %38, %45 : vector<4x8x8xf32>
    %47 = math.exp %46 : vector<4x8x8xf32>
    %c0_23 = arith.constant 0 : index
    %c0_24 = arith.constant 0 : index
    %c0_25 = arith.constant 0 : index
    %48 = vector.load %arg17[%c0_23, %c0_24, %c0_25] : memref<4x8x1xf32, #tpu.memory_space<vmem>>, vector<4x8x1xf32>
    %49 = arith.mulf %44, %48 : vector<4x8x1xf32>
    %cst_26 = arith.constant dense<0.000000e+00> : vector<4x8xf32>
    %50 = vector.multi_reduction <add>, %47, %cst_26 [2] : vector<4x8x8xf32> to vector<4x8xf32>
    %51 = vector.shape_cast %50 : vector<4x8xf32> to vector<4x8x1xf32>
    %52 = arith.addf %49, %51 : vector<4x8x1xf32>
    %c0_27 = arith.constant 0 : index
    %c0_28 = arith.constant 0 : index
    %c0_29 = arith.constant 0 : index
    %53 = vector.load %arg17[%c0_27, %c0_28, %c0_29] : memref<4x8x1xf32, #tpu.memory_space<vmem>>, vector<4x8x1xf32>
    tpu.vector_store %arg17[%c0_27, %c0_28, %c0_29], %52 {strides = array<i32>} : memref<4x8x1xf32, #tpu.memory_space<vmem>>, vector<4x8x1xf32>,
    %c0_30 = arith.constant 0 : index
    %c0_31 = arith.constant 0 : index
    %c0_32 = arith.constant 0 : index
    %54 = vector.load %arg18[%c0_30, %c0_31, %c0_32] : memref<4x8x4xf32, #tpu.memory_space<vmem>>, vector<4x8x4xf32>
    %55 = vector.broadcast %44 : vector<4x8x1xf32> to vector<4x8x4xf32>
    %56 = arith.mulf %55, %54 : vector<4x8x4xf32>
    %57 = arith.truncf %47 : vector<4x8x8xf32> to vector<4x8x8xbf16>
    "tpu.trace_start"() <{level = 10 : i32, message = "hqk,hkc->hqc"}> : () -> ()
    %cst_33 = arith.constant dense<0.000000e+00> : vector<4x8x4xf32>
    %58 = tpu.matmul %57, %36, %cst_33 {dimension_numbers = #tpu.dot_dimension_numbers<[2], [1], [1], [2], [0, 0, 0, 1, 1, 2], [0], [0]>} : vector<4x8x8xbf16>, vector<4x8x4xbf16>, vector<4x8x4xf32> -> vector<4x8x4xf32>
    "tpu.trace_stop"() : () -> ()
    %59 = arith.addf %56, %58 : vector<4x8x4xf32>
    %c0_34 = arith.constant 0 : index
    %c0_35 = arith.constant 0 : index
    %c0_36 = arith.constant 0 : index
    %60 = vector.load %arg18[%c0_34, %c0_35, %c0_36] : memref<4x8x4xf32, #tpu.memory_space<vmem>>, vector<4x8x4xf32>
    tpu.vector_store %arg18[%c0_34, %c0_35, %c0_36], %59 {strides = array<i32>} : memref<4x8x4xf32, #tpu.memory_space<vmem>>, vector<4x8x4xf32>,
    %c0_37 = arith.constant 0 : index
    %c0_38 = arith.constant 0 : index
    %c0_39 = arith.constant 0 : index
    %61 = vector.load %arg16[%c0_37, %c0_38, %c0_39] : memref<4x8x1xf32, #tpu.memory_space<vmem>>, vector<4x8x1xf32>
    tpu.vector_store %arg16[%c0_37, %c0_38, %c0_39], %42 {strides = array<i32>} : memref<4x8x1xf32, #tpu.memory_space<vmem>>, vector<4x8x1xf32>,
    %c0_i32_40 = arith.constant 0 : i32
    %62 = arith.cmpi eq, %arg2, %c0_i32_40 : i32
    %63 = arith.extui %62 : i1 to i32
    %c0_i32_41 = arith.constant 0 : i32
    %64 = arith.cmpi ne, %63, %c0_i32_41 : i32
    scf.if %64 {
      %c0_42 = arith.constant 0 : index
      %c0_43 = arith.constant 0 : index
      %c0_44 = arith.constant 0 : index
      %65 = vector.load %arg18[%c0_42, %c0_43, %c0_44] : memref<4x8x4xf32, #tpu.memory_space<vmem>>, vector<4x8x4xf32>
      %c0_45 = arith.constant 0 : index
      %c0_46 = arith.constant 0 : index
      %c0_47 = arith.constant 0 : index
      %66 = vector.load %arg17[%c0_45, %c0_46, %c0_47] : memref<4x8x1xf32, #tpu.memory_space<vmem>>, vector<4x8x1xf32>
      %67 = tpu.reciprocal %66 {approx = true} : vector<4x8x1xf32> -> vector<4x8x1xf32>
      %68 = vector.broadcast %67 : vector<4x8x1xf32> to vector<4x8x4xf32>
      %69 = arith.mulf %65, %68 : vector<4x8x4xf32>
      %70 = vector.extract_strided_slice %69 {offsets = [0, 0, 0], sizes = [1, 8, 4], strides = [1, 1, 1]} : vector<4x8x4xf32> to vector<1x8x4xf32>
      %71 = vector.shape_cast %70 : vector<1x8x4xf32> to vector<8x4xf32>
      %72 = vector.extract_strided_slice %69 {offsets = [1, 0, 0], sizes = [1, 8, 4], strides = [1, 1, 1]} : vector<4x8x4xf32> to vector<1x8x4xf32>
      %73 = vector.shape_cast %72 : vector<1x8x4xf32> to vector<8x4xf32>
      %74 = vector.extract_strided_slice %69 {offsets = [2, 0, 0], sizes = [1, 8, 4], strides = [1, 1, 1]} : vector<4x8x4xf32> to vector<1x8x4xf32>
      %75 = vector.shape_cast %74 : vector<1x8x4xf32> to vector<8x4xf32>
      %76 = vector.extract_strided_slice %69 {offsets = [3, 0, 0], sizes = [1, 8, 4], strides = [1, 1, 1]} : vector<4x8x4xf32> to vector<1x8x4xf32>
      %77 = vector.shape_cast %76 : vector<1x8x4xf32> to vector<8x4xf32>
      %78 = tpu.concatenate %71, %73, %75, %77 in 1 : vector<8x4xf32>, vector<8x4xf32>, vector<8x4xf32>, vector<8x4xf32> -> vector<8x16xf32>
      %79 = arith.truncf %78 : vector<8x16xf32> to vector<8x16xbf16>
      %c0_48 = arith.constant 0 : index
      %c0_49 = arith.constant 0 : index
      %80 = vector.load %arg12[%c0_48, %c0_49] : memref<16x32xbf16, #tpu.memory_space<vmem>>, vector<16x32xbf16>
      %cst_50 = arith.constant dense<0.000000e+00> : vector<8x32xf32>
      %81 = tpu.matmul %79, %80, %cst_50 {dimension_numbers = #tpu.dot_dimension_numbers<[1], [0], [0], [1], [0, 0, 1, 1], [], []>} : vector<8x16xbf16>, vector<16x32xbf16>, vector<8x32xf32> -> vector<8x32xf32>
      %c0_51 = arith.constant 0 : index
      %c0_52 = arith.constant 0 : index
      %82 = vector.load %arg13[%c0_51, %c0_52] : memref<1x32xf32, #tpu.memory_space<vmem>>, vector<1x32xf32>
      %83 = vector.broadcast %82 : vector<1x32xf32> to vector<8x32xf32>
      %84 = arith.addf %81, %83 : vector<8x32xf32>
      %c0_53 = arith.constant 0 : index
      %c0_54 = arith.constant 0 : index
      %c0_55 = arith.constant 0 : index
      %85 = vector.load %arg14[%c0_53, %c0_54, %c0_55] : memref<1x8x32xf32, #tpu.memory_space<vmem>>, vector<1x8x32xf32>
      %86 = vector.shape_cast %85 : vector<1x8x32xf32> to vector<8x32xf32>
      %87 = vector.shape_cast %84 : vector<8x32xf32> to vector<1x8x32xf32>
      tpu.vector_store %arg14[%c0_53, %c0_54, %c0_55], %87 {strides = array<i32>} : memref<1x8x32xf32, #tpu.memory_space<vmem>>, vector<1x8x32xf32>,
    } else {
    }
    return
  }
  func.func @transform_0(%arg0: i32, %arg1: i32, %arg2: i32) -> (i32, i32, i32) {
    %c0_i32 = arith.constant 0 : i32
    %c0_i32_0 = arith.constant 0 : i32
    return %arg0, %arg1, %c0_i32 : i32, i32, i32
  }
  func.func @transform_1(%arg0: i32, %arg1: i32, %arg2: i32) -> (i32, i32, i32) {
    %c0_i32 = arith.constant 0 : i32
    %c0_i32_0 = arith.constant 0 : i32
    return %arg0, %arg2, %c0_i32 : i32, i32, i32
  }
  func.func @transform_2(%arg0: i32, %arg1: i32, %arg2: i32) -> (i32, i32, i32) {
    %c0_i32 = arith.constant 0 : i32
    %c0_i32_0 = arith.constant 0 : i32
    return %arg0, %arg2, %c0_i32 : i32, i32, i32
  }
  func.func @transform_3(%arg0: i32, %arg1: i32, %arg2: i32) -> (i32, i32) {
    %c0_i32 = arith.constant 0 : i32
    %c0_i32_0 = arith.constant 0 : i32
    %c0_i32_1 = arith.constant 0 : i32
    return %c0_i32, %c0_i32_0 : i32, i32
  }
  func.func @transform_4(%arg0: i32, %arg1: i32, %arg2: i32) -> (i32, i32) {
    %c0_i32 = arith.constant 0 : i32
    %c0_i32_0 = arith.constant 0 : i32
    %c0_i32_1 = arith.constant 0 : i32
    return %c0_i32, %c0_i32_0 : i32, i32
  }
  func.func @transform_5(%arg0: i32, %arg1: i32, %arg2: i32) -> (i32, i32) {
    %c0_i32 = arith.constant 0 : i32
    %c0_i32_0 = arith.constant 0 : i32
    %c0_i32_1 = arith.constant 0 : i32
    return %c0_i32, %c0_i32_0 : i32, i32
  }
  func.func @transform_6(%arg0: i32, %arg1: i32, %arg2: i32) -> (i32, i32) {
    %c0_i32 = arith.constant 0 : i32
    %c0_i32_0 = arith.constant 0 : i32
    %c0_i32_1 = arith.constant 0 : i32
    return %c0_i32, %c0_i32_0 : i32, i32
  }
  func.func @transform_7(%arg0: i32, %arg1: i32, %arg2: i32) -> (i32, i32) {
    %c0_i32 = arith.constant 0 : i32
    %c0_i32_0 = arith.constant 0 : i32
    %c0_i32_1 = arith.constant 0 : i32
    return %c0_i32, %c0_i32_0 : i32, i32
  }
  func.func @transform_8(%arg0: i32, %arg1: i32, %arg2: i32) -> (i32, i32) {
    %c0_i32 = arith.constant 0 : i32
    %c0_i32_0 = arith.constant 0 : i32
    %c0_i32_1 = arith.constant 0 : i32
    return %c0_i32, %c0_i32_0 : i32, i32
  }
  func.func @transform_9(%arg0: i32, %arg1: i32, %arg2: i32) -> (i32, i32) {
    %c0_i32 = arith.constant 0 : i32
    %c0_i32_0 = arith.constant 0 : i32
    %c0_i32_1 = arith.constant 0 : i32
    return %c0_i32, %c0_i32_0 : i32, i32
  }
  func.func @transform_10(%arg0: i32, %arg1: i32, %arg2: i32) -> (i32, i32) {
    %c0_i32 = arith.constant 0 : i32
    %c0_i32_0 = arith.constant 0 : i32
    %c0_i32_1 = arith.constant 0 : i32
    return %c0_i32, %c0_i32_0 : i32, i32
  }
  func.func @transform_11(%arg0: i32, %arg1: i32, %arg2: i32) -> (i32, i32, i32) {
    %c0_i32 = arith.constant 0 : i32
    %c0_i32_0 = arith.constant 0 : i32
    return %arg0, %arg1, %c0_i32 : i32, i32, i32
  }
}

</mosaic_0001>

<bundles_post_ra>
// kernel: tpu_custom_call.1
= control target key start
LH: loop header
LB: loop body
LE: loop exit
PB: predicated region body
PF: predicated region fallthrough
CT: control target
= control target key end

     0   :  { %s3239_s0 = inlined_call_operand.hbm [shape: bf16[2,8,32], index: 0, kind: input, shape index: {}]   ;;  %s3240_s1 = inlined_call_operand.hbm [shape: bf16[2,8,32], index: 1, kind: input, shape index: {}]   ;;  %s3241_s2 = inlined_call_operand.hbm [shape: bf16[2,8,32], index: 2, kind: input, shape index: {}]   ;;  %s3242_s3 = inlined_call_operand.hbm [shape: bf16[32,16], index: 3, kind: input, shape index: {}]   ;;  %s3243_s4 = inlined_call_operand.hbm [shape: f32[1,16], index: 4, kind: input, shape index: {}]   ;;  %s3244_s5 = inlined_call_operand.hbm [shape: bf16[32,16], index: 5, kind: input, shape index: {}]   ;;  %s3245_s6 = inlined_call_operand.hbm [shape: f32[1,16], index: 6, kind: input, shape index: {}]   ;;  %s3246_s7 = inlined_call_operand.hbm [shape: bf16[32,16], index: 7, kind: input, shape index: {}]   ;;  %s3247_s8 = inlined_call_operand.hbm [shape: f32[1,16], index: 8, kind: input, shape index: {}]   ;;  %s3248_s9 = inlined_call_operand.hbm [shape: bf16[16,32], index: 9, kind: input, shape index: {}]   ;;  %s3249_s10 = inlined_call_operand.hbm [shape: f32[1,32], index: 10, kind: input, shape index: {}]   ;;  %s3250_s11 = inlined_call_operand.hbm [shape: f32[2,8,32], index: 11, kind: output, shape index: {}]  }
   0x1   :  { %3272 = sst [smem:[#allocation38_spill]] %s3239_s0 }
   0x2   :  { %3273 = sst [smem:[#allocation39_spill]] %s3240_s1 }
   0x3   :  { %3274 = sst [smem:[#allocation40_spill]] %s3241_s2 }
   0x4   :  { %3275 = sst [smem:[#allocation41_spill]] %s3242_s3 }
   0x5   :  { %3276 = sst [smem:[#allocation42_spill]] %s3244_s5 }
   0x6   :  { %3277 = sst [smem:[#allocation43_spill]] %s3246_s7 }
   0x7   :  { %3278 = sst [smem:[#allocation44_spill]] %s3248_s9 }
   0x8   :  { %3279 = sst [smem:[#allocation45_spill]] %s3250_s11 }
   0x9   :  { %16 = vsyncpa [#allocation7], 0 }
   0xa   :  { %18 = vsyncpa [#allocation7 + $0x1], 0 }
   0xb   :  { %19 = vsyncpa [#allocation10], 0 }
   0xc   :  { %21 = vsyncpa [#allocation10 + $0x1], 0 }
   0xd   :  { %22 = vsyncpa [#allocation13], 0 }
   0xe   :  { %23 = vsyncpa [#allocation16], 0 }
   0xf   :  { %24 = vsyncpa [#allocation19], 0 }
  0x10   :  { %25 = vsyncpa [#allocation22], 0 }
  0x11   :  { %26 = vsyncpa [#allocation8], 0 }
  0x12   :  { %28 = vsyncpa [#allocation8 + $0x1], 0  ;;  %s2605_s17 = smov 0   ;;  %s2607_s18 = smov 0  }
  0x13   :  { %s2609_s19 = smov 0   ;;  %s2611_s20 = smov 0  }
  0x14   :  { %s2613_s21 = smov 0   ;;  %s2615_s22 = smov 0  }
  0x15 LB: > { %3280 = sst [smem:[#allocation32_spill]] %s2511_s20  ;;  %s2636_s23 = sadd.s32 4294967295, %s2519_s22   ;;  %s2519_s22 = sphi %s2615_s22, %s34_s22   ;;  %s2515_s21 = sphi %s2613_s21, %s3329_s21   ;;  %s2511_s20 = sphi %s2611_s20, %s3333_s20   ;;  %s2507_s19 = sphi %s2609_s19, %s3332_s19   ;;  %s2503_s18 = sphi %s2607_s18, %s3331_s18   ;;  %s2499_s17 = sphi %s2605_s17, %s3330_s17  }
  0x16   : > { %3281 = sst [smem:[#allocation33_spill]] %s2515_s21  ;;  %p1729_p0 = scmp.ge.s32.totalorder %s2519_s22, 1 }
  0x17   : > { %3282 = sst [smem:[#allocation34_spill]] %s2519_s22  ;;  %p3255_p1 = scmp.eq.s32.totalorder %s2636_s23, 0 }
  0x18   : > { %p338_p2 = scmp.lt.s32.totalorder %s2519_s22, 3  ;;  %s2521_s25 = smov [#allocation12]  }
  0x19   : > { %s350_s26 = sshll.u32 %s2521_s25, 4  ;;  %s2522_s28 = smov [#allocation15]   ;;  %s2645_s26 = int_to_ptr.vmem [resolvable:$true] %s350_s26 }
  0x1a   : > { %p2641_p3 = pnand %p1729_p0, %p338_p2  ;;  %s374_s29 = sshll.u32 %s2522_s28, 4  ;;  %s2656_s29 = int_to_ptr.vmem [resolvable:$true] %s374_s29 }
  0x1b   : > { %s2523_s30 = smov [#allocation18]   ;;  %s3286_s3 = sld [smem:[#allocation41_spill]] }
  0x1c   : > { %s3283_s24 = scalar_select %p2641_p3, 1, 0 }
  0x1d   : > { %p1930_p4 = pneg %p2641_p3  ;;  %s2658_s12 = sshll.u32 %s2523_s30, 4  ;;  %s399_s12 = int_to_ptr.vmem [resolvable:$true] %s2658_s12 }
  0x1e   : > { %3284 = sst [smem:[#allocation35_spill]] %s3283_s24 }
  0x1f   : > { %p2652_p6 = pnand %p1930_p4, %p3255_p1 }
  0x21   : > { %s3285_s27 = scalar_select %p2652_p6, 1, 0 }
  0x22   : > { %s2103_s15 = scalar_lea.hbm %s3286_s3, 256  ;;  %p2668_p8 = pneg %p2652_p6 }
  0x23   : > { %p2104_p7 = scmp.ne.s32.totalorder %s3286_s3, %s2103_s15  ;;  %p2110_p11 = scmp.lt.u32.totalorder %s2103_s15, %s3286_s3 }
  0x24   : > { %s3287_s11 = scalar_select %p2668_p8, 1, 0 }
  0x25   : > { %p2106_p9 = pnand %p2668_p8, %p2104_p7 }
  0x27   : > { %p2107_p10 = pneg %p2106_p9 }
  0x29   : > { %p2112_p12 = pnand %p2110_p11, %p2107_p10 }
  0x2b   : > { %2115 = shalt.err (!%p2112_p12)
}
  0x2c   : > { %s2116_s13 = scalar_lea.vmem %s2645_s26, 256  ;;  %p2124_p4 = scmp.lt.s32.totalorder %s2645_s26, %s2645_s26 }
  0x2d   : > { %p2117_p13 = scmp.ne.s32.totalorder %s2645_s26, %s2116_s13  ;;  %p2125_p5 = scmp.lt.s32.totalorder %s2116_s13, %s2116_s13 }
  0x2f   : > { %p2119_p0 = pnand %p2117_p13, %p2668_p8  ;;  %p2126_p7 = por %p2125_p5, %p2124_p4 }
  0x31   : > { %p2120_p2 = pneg %p2119_p0 }
  0x33   : > { %p2127_p9 = pnand %p2126_p7, %p2120_p2 }
  0x35   : > { %2130 = shalt.err (!%p2127_p9)
}
  0x36   : > { %s2524_s14 = smov 64   ;;  %s2525_s15 = smov 4  }
  0x37   : > { %1933 = dma.hbm_to_vmem [thread:$0]  (!%p2652_p6), %s3286_s3, 256, %s2645_s26, [#allocation13], %s2524_s14, %s2524_s14, %s2525_s15  }
  0x38   : > { %s3288_s5 = sld [smem:[#allocation42_spill]] }
  0x3e   : > { %s2131_s13 = scalar_lea.hbm %s3288_s5, 256 }
  0x3f   : > { %p2132_p5 = scmp.ne.s32.totalorder %s3288_s5, %s2131_s13  ;;  %p2138_p12 = scmp.lt.u32.totalorder %s2131_s13, %s3288_s5 }
  0x41   : > { %p2134_p10 = pnand %p2132_p5, %p2668_p8 }
  0x43   : > { %p2135_p11 = pneg %p2134_p10 }
  0x45   : > { %p2140_p13 = pnand %p2138_p12, %p2135_p11 }
  0x47   : > { %2143 = shalt.err (!%p2140_p13)
}
  0x48   : > { %s2144_s26 = scalar_lea.vmem %s2656_s29, 256  ;;  %p2152_p7 = scmp.lt.s32.totalorder %s2656_s29, %s2656_s29 }
  0x49   : > { %p2145_p0 = scmp.ne.s32.totalorder %s2656_s29, %s2144_s26  ;;  %p2153_p9 = scmp.lt.s32.totalorder %s2144_s26, %s2144_s26 }
  0x4b   : > { %p2147_p2 = pnand %p2145_p0, %p2668_p8  ;;  %p2154_p5 = por %p2153_p9, %p2152_p7 }
  0x4d   : > { %p2148_p4 = pneg %p2147_p2 }
  0x4f   : > { %p2155_p10 = pnand %p2154_p5, %p2148_p4 }
  0x51   : > { %2158 = shalt.err (!%p2155_p10)
}
  0x52   : > { %1939 = dma.hbm_to_vmem [thread:$0]  (!%p2652_p6), %s3288_s5, 256, %s2656_s29, [#allocation16], %s2524_s14, %s2524_s14, %s2525_s15  }
  0x53   : > { %s3289_s7 = sld [smem:[#allocation43_spill]] }
  0x59   : > { %s2159_s16 = scalar_lea.hbm %s3289_s7, 256 }
  0x5a   : > { %p2160_p11 = scmp.ne.s32.totalorder %s3289_s7, %s2159_s16  ;;  %p2166_p0 = scmp.lt.u32.totalorder %s2159_s16, %s3289_s7 }
  0x5c   : > { %p2162_p12 = pnand %p2160_p11, %p2668_p8 }
  0x5e   : > { %p2163_p13 = pneg %p2162_p12 }
  0x60   : > { %p2168_p2 = pnand %p2166_p0, %p2163_p13 }
  0x62   : > { %2171 = shalt.err (!%p2168_p2)
}
  0x63   : > { %s2172_s26 = scalar_lea.vmem %s399_s12, 256  ;;  %p2180_p5 = scmp.lt.s32.totalorder %s399_s12, %s399_s12 }
  0x64   : > { %p2173_p4 = scmp.ne.s32.totalorder %s399_s12, %s2172_s26  ;;  %p2181_p10 = scmp.lt.s32.totalorder %s2172_s26, %s2172_s26 }
  0x66   : > { %p2175_p7 = pnand %p2173_p4, %p2668_p8  ;;  %p2182_p1 = por %p2181_p10, %p2180_p5 }
  0x68   : > { %p2176_p9 = pneg %p2175_p7 }
  0x6a   : > { %p2183_p3 = pnand %p2182_p1, %p2176_p9 }
  0x6c   : > { %2186 = shalt.err (!%p2183_p3)
}
  0x6d   : > { %1945 = dma.hbm_to_vmem [thread:$0]  (!%p2652_p6), %s3289_s7, 256, %s399_s12, [#allocation19], %s2524_s14, %s2524_s14, %s2525_s15  }
  0x6e   : > { %s2526_s2 = smov [#allocation21]   ;;  %s3290_s9 = sld [smem:[#allocation44_spill]] }
  0x6f   : > { %s422_s20 = sshll.u32 %s2526_s2, 4  ;;  %s423_s20 = int_to_ptr.vmem [resolvable:$true] %s422_s20 }
  0x74   : > { %s2187_s25 = scalar_lea.hbm %s3290_s9, 128 }
  0x75   : > { %p2188_p1 = scmp.ne.s32.totalorder %s3290_s9, %s2187_s25  ;;  %p2194_p12 = scmp.lt.u32.totalorder %s2187_s25, %s3290_s9 }
  0x77   : > { %p2190_p3 = pnand %p2188_p1, %p2668_p8 }
  0x79   : > { %p2191_p11 = pneg %p2190_p3 }
  0x7b   : > { %p2196_p13 = pnand %p2194_p12, %p2191_p11 }
  0x7d   : > { %2199 = shalt.err (!%p2196_p13)
}
  0x7e   : > { %s2200_s12 = scalar_lea.vmem %s423_s20, 128  ;;  %p2208_p7 = scmp.lt.s32.totalorder %s423_s20, %s423_s20 }
  0x7f   : > { %p2201_p0 = scmp.ne.s32.totalorder %s423_s20, %s2200_s12  ;;  %p2209_p9 = scmp.lt.s32.totalorder %s2200_s12, %s2200_s12 }
  0x81   : > { %p2203_p2 = pnand %p2201_p0, %p2668_p8  ;;  %p2210_p5 = por %p2209_p9, %p2208_p7 }
  0x83   : > { %p2204_p4 = pneg %p2203_p2 }
  0x85   : > { %p2211_p10 = pnand %p2210_p5, %p2204_p4 }
  0x87   : > { %2214 = shalt.err (!%p2211_p10)
}
  0x88   : > { %1951 = dma.hbm_to_vmem [thread:$0]  (!%p2652_p6), %s3290_s9, 128, %s423_s20, [#allocation22], %s2524_s14, %s2524_s14, %s2525_s15  }
  0x89   : > { %s1728_s2 = sadd.s32 4294967294, %s2519_s22   ;;  %s53_s24 = sadd.s32 1, %s2515_s21 }
  0x8a   : > { %p55_p1 = scmp.ge.s32.totalorder %s53_s24, 2  ;;  %s62_s16 = sadd.s32 1, %s2507_s19 }
  0x8b   : > { %p69_p3 = scmp.ne.s32.totalorder %s2507_s19, %s2503_s18  ;;  %p70_p11 = scmp.eq.s32.totalorder %s2519_s22, 0 }
  0x8c   : > { %s3335_s24 = smov (%p55_p1, %s53_s24), 0  ;;  %p75_p13 = scmp.ne.s32.totalorder %s2503_s18, %s2499_s17 }
  0x8d   : > { %3291 = sst [smem:[#allocation36_spill]] %s3335_s24  ;;  %p2769_p12 = por %p70_p11, %p69_p3 }
  0x8e   : > { %s57_s14 = ssub.s32 %s2515_s21, %s3335_s24  ;;  %p325_p0 = scmp.eq.s32.totalorder %s2636_s23, 1 }
  0x8f   : > { %p60_p2 = scmp.eq.s32.totalorder %s57_s14, 0  ;;  %p3293_p4 = scmp.eq.s32.totalorder %s2636_s23, 0 }
  0x90   : > { %p2784_p9 = por %p325_p0, %p69_p3  ;;  %p331_p5 = scmp.eq.s32.totalorder %s1728_s2, 1 }
  0x91   : > { %p2780_p7 = por %p3293_p4, %p75_p13  ;;  %p1977_p1 = scmp.lt.s32.totalorder %s2519_s22, 2 }
  0x92   : > { %s3295_s20 = scalar_select %p2784_p9, 1, 0 }
  0x93   : > { %s3294_s15 = scalar_select %p2780_p7, 1, 0 }
  0x94   : > { %s2789_s28 = scalar_select %p60_p2, %s2507_s19, %s62_s16  }
  0x95   : > { %p2791_p10 = por %p331_p5, %p75_p13  ;;  %s3257_s13 = sand.u32 1, %s2507_s19  }
  0x96   : > { %3296 = sst [smem:[#allocation37_spill]] %s2789_s28  ;;  %s2798_s26 = sshll.u32 %s2515_s21, 6 }
  0x97   : > { %s3297_s30 = scalar_select %p2791_p10, 1, 0 }
  0x98   : > { %s2802_s12 = sshll.u32 %s3257_s13, 2  ;;  %p2806_p3 = pnand %p1977_p1, %p2769_p12 }
  0x99   : > { %s466_s0 = sand.u32 1, %s2519_s22   ;;  %s3299_s1 = sld [smem:[#allocation39_spill]] }
  0x9a   : > { %s3298_s29 = scalar_select %p2806_p3, 1, 0 }
  0x9b   : > { %s470_s3 = scalar_lea.vmem [#allocation9], %s2802_s12  ;;  %s2820_s25 = scalar_lea.sflag [#allocation10], %s466_s0 }
  0x9c   : > { %s478_s13 = sshll.u32 %s470_s3, 4  ;;  %p2826_p12 = pneg %p2806_p3  ;;  %s2818_s13 = int_to_ptr.vmem [resolvable:$true] %s478_s13 }
  0x9e   : > { %s3300_s7 = scalar_select %p2826_p12, 1, 0 }
  0x9f   : > { %s2815_s14 = scalar_lea.hbm %s3299_s1, %s2798_s26  ;;  %s2220_s9 = scalar_lea.hbm %s3299_s1, 128 }
  0xa0   : > { %s2215_s5 = scalar_lea.hbm %s2815_s14, 64  ;;  %p2221_p2 = scmp.lt.u32.totalorder %s2815_s14, %s3299_s1 }
  0xa1   : > { %p2216_p11 = scmp.ne.s32.totalorder %s2815_s14, %s2215_s5  ;;  %p2222_p4 = scmp.lt.u32.totalorder %s2220_s9, %s2215_s5 }
  0xa2   : > { %p2224_p1 = scmp.lt.u32.totalorder %s2215_s5, %s2815_s14 }
  0xa3   : > { %p2218_p13 = pnand %p2826_p12, %p2216_p11  ;;  %p2223_p5 = por %p2222_p4, %p2221_p2 }
  0xa5   : > { %p2219_p0 = pneg %p2218_p13  ;;  %p2225_p10 = por %p2224_p1, %p2223_p5 }
  0xa7   : > { %p2226_p9 = pnand %p2225_p10, %p2219_p0 }
  0xa9   : > { %2229 = shalt.err (!%p2226_p9)
}
  0xaa   : > { %s2230_s0 = scalar_lea.vmem %s2818_s13, 64  ;;  %s2527_s2 = smov [#allocation9]  }
  0xab   : > { %p2231_p11 = scmp.ne.s32.totalorder %s2818_s13, %s2230_s0  ;;  %s2235_s16 = sshll.u32 %s2527_s2, 4  ;;  %s2236_s16 = int_to_ptr.vmem [resolvable:$false] %s2235_s16 }
  0xac   : > { %s2237_s24 = scalar_lea.vmem %s2236_s16, 128  ;;  %p2238_p6 = scmp.lt.s32.totalorder %s2818_s13, %s2236_s16 }
  0xad   : > { %p2233_p13 = pnand %p2231_p11, %p2826_p12  ;;  %p2239_p8 = scmp.lt.s32.totalorder %s2237_s24, %s2230_s0 }
  0xaf   : > { %p2234_p7 = pneg %p2233_p13  ;;  %p2240_p2 = por %p2239_p8, %p2238_p6 }
  0xb1   : > { %p2241_p4 = pnand %p2240_p2, %p2234_p7 }
  0xb3   : > { %2244 = shalt.err (!%p2241_p4)
}
  0xb4   : > { %1961 = dma.hbm_to_vmem [thread:$0]  (!%p2806_p3), %s2815_s14, 64, %s2818_s13, %s2820_s25  }
  0xb5   : > { %s2528_s5 = smov [#allocation14]   ;;  %s2529_s3 = smov [#allocation17]  }
  0xb6   : > { %s364_s9 = sshll.u32 %s2528_s5, 4  ;;  %s388_s1 = sshll.u32 %s2529_s3, 4  ;;  %s365_s9 = int_to_ptr.vmem [resolvable:$true] %s364_s9  ;;  %s389_s1 = int_to_ptr.vmem [resolvable:$true] %s388_s1 }
  0xb7   : > { %s2245_s16 = scalar_lea.hbm %s3243_s4, 16  ;;  %p3301_p8 = scmp.ne.s32.totalorder %s3287_s11, 0 }
  0xb8   : > { %p2246_p6 = scmp.ne.s32.totalorder %s3243_s4, %s2245_s16  ;;  %p2252_p10 = scmp.lt.u32.totalorder %s2245_s16, %s3243_s4 }
  0xba   : > { %p2248_p7 = pnand %p2246_p6, %p3301_p8 }
  0xbc   : > { %p2249_p9 = pneg %p2248_p7 }
  0xbe   : > { %p2254_p0 = pnand %p2252_p10, %p2249_p9 }
  0xc0   : > { %2257 = shalt.err (!%p2254_p0)
}
  0xc1   : > { %s2258_s13 = scalar_lea.vmem %s365_s9, 16  ;;  %s2265_s21 = scalar_lea.vmem %s365_s9, 32 }
  0xc2   : > { %p2259_p5 = scmp.ne.s32.totalorder %s365_s9, %s2258_s13  ;;  %p2266_p13 = scmp.lt.s32.totalorder %s365_s9, %s365_s9 }
  0xc3   : > { %p2267_p2 = scmp.lt.s32.totalorder %s2265_s21, %s2258_s13 }
  0xc4   : > { %p2261_p1 = pnand %p2259_p5, %p3301_p8 }
  0xc5   : > { %p2268_p4 = por %p2267_p2, %p2266_p13 }
  0xc6   : > { %p2262_p11 = pneg %p2261_p1 }
  0xc8   : > { %p2269_p3 = pnand %p2268_p4, %p2262_p11 }
  0xca   : > { %2272 = shalt.err (!%p2269_p3)
}
  0xcb   : > { %p3302_p6 = scmp.ne.s32.totalorder %s3285_s27, 0  ;;  %s2273_s3 = scalar_lea.hbm %s3245_s6, 16 }
  0xcc   : > { %p2274_p7 = scmp.ne.s32.totalorder %s3245_s6, %s2273_s3  ;;  %p2280_p3 = scmp.lt.u32.totalorder %s2273_s3, %s3245_s6 }
  0xcd   : > { %1936 = dma.hbm_to_vmem [thread:$0]  (!%p3302_p6), %s3243_s4, 16, %s365_s9, [#allocation13]  }
  0xce   : > { %p2276_p9 = pnand %p2274_p7, %p3301_p8 }
  0xd0   : > { %p2277_p10 = pneg %p2276_p9 }
  0xd2   : > { %p2282_p0 = pnand %p2280_p3, %p2277_p10 }
  0xd4   : > { %2285 = shalt.err (!%p2282_p0)
}
  0xd5   : > { %s2286_s13 = scalar_lea.vmem %s389_s1, 16  ;;  %s2293_s9 = scalar_lea.vmem %s389_s1, 32 }
  0xd6   : > { %p2287_p5 = scmp.ne.s32.totalorder %s389_s1, %s2286_s13  ;;  %p2294_p13 = scmp.lt.s32.totalorder %s389_s1, %s389_s1 }
  0xd7   : > { %p2295_p2 = scmp.lt.s32.totalorder %s2293_s9, %s2286_s13 }
  0xd8   : > { %p2289_p1 = pnand %p2287_p5, %p3301_p8 }
  0xd9   : > { %p2296_p4 = por %p2295_p2, %p2294_p13 }
  0xda   : > { %p2290_p11 = pneg %p2289_p1 }
  0xdc   : > { %p2297_p12 = pnand %p2296_p4, %p2290_p11 }
  0xde   : > { %2300 = shalt.err (!%p2297_p12)
}
  0xdf   : > { %1942 = dma.hbm_to_vmem [thread:$0]  (!%p3302_p6), %s3245_s6, 16, %s389_s1, [#allocation16]  }
  0xe0   : > { %s2530_s5 = smov [#allocation20]   ;;  %s2531_s28 = smov [#allocation23]  }
  0xe1   : > { %s412_s22 = sshll.u32 %s2530_s5, 4  ;;  %s436_s3 = sshll.u32 %s2531_s28, 4  ;;  %s413_s22 = int_to_ptr.vmem [resolvable:$true] %s412_s22  ;;  %s437_s3 = int_to_ptr.vmem [resolvable:$true] %s436_s3 }
  0xe2   : > { %s2301_s0 = scalar_lea.hbm %s3247_s8, 16 }
  0xe3   : > { %p2302_p12 = scmp.ne.s32.totalorder %s3247_s8, %s2301_s0  ;;  %p2308_p10 = scmp.lt.u32.totalorder %s2301_s0, %s3247_s8 }
  0xe5   : > { %p2304_p7 = pnand %p2302_p12, %p3301_p8 }
  0xe7   : > { %p2305_p9 = pneg %p2304_p7 }
  0xe9   : > { %p2310_p3 = pnand %p2308_p10, %p2305_p9 }
  0xeb   : > { %2313 = shalt.err (!%p2310_p3)
}
  0xec   : > { %s2314_s1 = scalar_lea.vmem %s413_s22, 16  ;;  %s2321_s14 = scalar_lea.vmem %s413_s22, 32 }
  0xed   : > { %p2315_p0 = scmp.ne.s32.totalorder %s413_s22, %s2314_s1  ;;  %p2322_p11 = scmp.lt.s32.totalorder %s413_s22, %s413_s22 }
  0xee   : > { %p2323_p13 = scmp.lt.s32.totalorder %s2321_s14, %s2314_s1 }
  0xef   : > { %p2317_p5 = pnand %p2315_p0, %p3301_p8 }
  0xf0   : > { %p2324_p2 = por %p2323_p13, %p2322_p11 }
  0xf1   : > { %p2318_p1 = pneg %p2317_p5 }
  0xf3   : > { %p2325_p4 = pnand %p2324_p2, %p2318_p1 }
  0xf5   : > { %2328 = shalt.err (!%p2325_p4)
}
  0xf6   : > { %1948 = dma.hbm_to_vmem [thread:$0]  (!%p3302_p6), %s3247_s8, 16, %s413_s22, [#allocation19]  }
  0xf7   : > { %s2329_s0 = scalar_lea.hbm %s3249_s10, 16 }
  0xf8   : > { %p2330_p12 = scmp.ne.s32.totalorder %s3249_s10, %s2329_s0  ;;  %p2336_p10 = scmp.lt.u32.totalorder %s2329_s0, %s3249_s10 }
  0xfa   : > { %p2332_p7 = pnand %p2330_p12, %p3301_p8 }
  0xfc   : > { %p2333_p9 = pneg %p2332_p7 }
  0xfe   : > { %p2338_p3 = pnand %p2336_p10, %p2333_p9 }
 0x100   : > { %2341 = shalt.err (!%p2338_p3)
}
 0x101   : > { %s2342_s1 = scalar_lea.vmem %s437_s3, 16  ;;  %s2349_s22 = scalar_lea.vmem %s437_s3, 32 }
 0x102   : > { %p2343_p0 = scmp.ne.s32.totalorder %s437_s3, %s2342_s1  ;;  %p2350_p11 = scmp.lt.s32.totalorder %s437_s3, %s437_s3 }
 0x103   : > { %p2351_p13 = scmp.lt.s32.totalorder %s2349_s22, %s2342_s1 }
 0x104   : > { %p2345_p5 = pnand %p2343_p0, %p3301_p8 }
 0x105   : > { %p2352_p2 = por %p2351_p13, %p2350_p11 }
 0x106   : > { %p2346_p1 = pneg %p2345_p5 }
 0x108   : > { %p2353_p4 = pnand %p2352_p2, %p2346_p1 }
 0x10a   : > { %2356 = shalt.err (!%p2353_p4)
}
 0x10b   : > { %1954 = dma.hbm_to_vmem [thread:$0]  (!%p3302_p6), %s3249_s10, 16, %s437_s3, [#allocation22]  }
 0x10c   : > { %s3303_s2 = sld [smem:[#allocation38_spill]]  ;;  %s451_s0 = scalar_lea.vmem [#allocation6], %s2802_s12 }
 0x10d   : > { %s459_s27 = sshll.u32 %s451_s0, 4  ;;  %s3304_s9 = sld [smem:[#allocation40_spill]]  ;;  %s2929_s27 = int_to_ptr.vmem [resolvable:$true] %s459_s27 }
 0x10e   : > { %s3305_s1 = sand.u32 1, %s2507_s19   ;;  %p3306_p6 = scmp.ne.s32.totalorder %s3300_s7, 0 }
 0x10f   : > { %s448_s3 = scalar_lea.sflag [#allocation7], %s3305_s1 }
 0x112   : > { %s2926_s16 = scalar_lea.hbm %s3303_s2, %s2798_s26  ;;  %s2362_s11 = scalar_lea.hbm %s3303_s2, 128 }
 0x113   : > { %s2935_s21 = scalar_lea.hbm %s3304_s9, %s2798_s26  ;;  %s2357_s22 = scalar_lea.hbm %s2926_s16, 64 }
 0x114   : > { %p2358_p8 = scmp.ne.s32.totalorder %s2926_s16, %s2357_s22  ;;  %p2363_p9 = scmp.lt.u32.totalorder %s2926_s16, %s3303_s2 }
 0x115   : > { %p2364_p10 = scmp.lt.u32.totalorder %s2362_s11, %s2357_s22  ;;  %p2366_p0 = scmp.lt.u32.totalorder %s2357_s22, %s2926_s16 }
 0x116   : > { %p2360_p12 = pnand %p2358_p8, %p3306_p6 }
 0x117   : > { %p2365_p3 = por %p2364_p10, %p2363_p9 }
 0x118   : > { %p2361_p7 = pneg %p2360_p12 }
 0x119   : > { %p2367_p5 = por %p2366_p0, %p2365_p3 }
 0x11b   : > { %p2368_p1 = pnand %p2367_p5, %p2361_p7 }
 0x11d   : > { %2371 = shalt.err (!%p2368_p1)
}
 0x11e   : > { %s2372_s26 = scalar_lea.vmem %s2929_s27, 64  ;;  %s2532_s24 = smov [#allocation6]  }
 0x11f   : > { %p2373_p11 = scmp.ne.s32.totalorder %s2929_s27, %s2372_s26  ;;  %s2377_s13 = sshll.u32 %s2532_s24, 4  ;;  %s2378_s13 = int_to_ptr.vmem [resolvable:$false] %s2377_s13 }
 0x120   : > { %s2379_s1 = scalar_lea.vmem %s2378_s13, 128  ;;  %p2380_p4 = scmp.lt.s32.totalorder %s2929_s27, %s2378_s13 }
 0x121   : > { %p2375_p13 = pnand %p2373_p11, %p3306_p6  ;;  %p2381_p8 = scmp.lt.s32.totalorder %s2379_s1, %s2372_s26 }
 0x123   : > { %p2376_p2 = pneg %p2375_p13  ;;  %p2382_p12 = por %p2381_p8, %p2380_p4 }
 0x125   : > { %p2383_p9 = pnand %p2382_p12, %p2376_p2 }
 0x127   : > { %2386 = shalt.err (!%p2383_p9)
}
 0x128   : > { %p3307_p7 = scmp.ne.s32.totalorder %s3298_s29, 0  ;;  %s489_s22 = scalar_lea.vmem [#allocation11], %s2802_s12 }
 0x129   : > { %s497_s14 = sshll.u32 %s489_s22, 4  ;;  %s2387_s5 = scalar_lea.hbm %s2935_s21, 64  ;;  %s498_s14 = int_to_ptr.vmem [resolvable:$true] %s497_s14 }
 0x12a   : > { %1958 = dma.hbm_to_vmem [thread:$0]  (!%p3307_p7), %s2926_s16, 64, %s2929_s27, %s448_s3  }
 0x12b   : > { %p2388_p10 = scmp.ne.s32.totalorder %s2935_s21, %s2387_s5  ;;  %s2392_s0 = scalar_lea.hbm %s3304_s9, 128 }
 0x12c   : > { %p2393_p5 = scmp.lt.u32.totalorder %s2935_s21, %s3304_s9  ;;  %p2394_p1 = scmp.lt.u32.totalorder %s2392_s0, %s2387_s5 }
 0x12d   : > { %p2390_p3 = pnand %p2388_p10, %p3306_p6  ;;  %p2396_p13 = scmp.lt.u32.totalorder %s2387_s5, %s2935_s21 }
 0x12e   : > { %p2395_p11 = por %p2394_p1, %p2393_p5 }
 0x12f   : > { %p2391_p0 = pneg %p2390_p3 }
 0x130   : > { %p2397_p2 = por %p2396_p13, %p2395_p11 }
 0x132   : > { %p2398_p4 = pnand %p2397_p2, %p2391_p0 }
 0x134   : > { %2401 = shalt.err (!%p2398_p4)
}
 0x135   : > { %s2402_s12 = scalar_lea.vmem %s498_s14, 64  ;;  %s2533_s16 = smov [#allocation11]  }
 0x136   : > { %p2403_p8 = scmp.ne.s32.totalorder %s498_s14, %s2402_s12  ;;  %s2407_s27 = sshll.u32 %s2533_s16, 4  ;;  %s2408_s27 = int_to_ptr.vmem [resolvable:$false] %s2407_s27 }
 0x137   : > { %s2409_s3 = scalar_lea.vmem %s2408_s27, 128  ;;  %p2410_p10 = scmp.lt.s32.totalorder %s498_s14, %s2408_s27 }
 0x138   : > { %p2405_p12 = pnand %p2403_p8, %p3306_p6  ;;  %p2411_p3 = scmp.lt.s32.totalorder %s2409_s3, %s2402_s12 }
 0x13a   : > { %p2406_p9 = pneg %p2405_p12  ;;  %p2412_p7 = por %p2411_p3, %p2410_p10 }
 0x13c   : > { %p2413_p1 = pnand %p2412_p7, %p2406_p9 }
 0x13e   : > { %2416 = shalt.err (!%p2413_p1)
}
 0x13f   : > { %p3308_p5 = scmp.ne.s32.totalorder %s3298_s29, 0  ;;  %s3309_s13 = sld [smem:[#allocation35_spill]] }
 0x141   : > { %1964 = dma.hbm_to_vmem [thread:$0]  (!%p3308_p5), %s2935_s21, 64, %s498_s14, %s2820_s25  }
 0x145   : > { %p3310_p0 = scmp.ne.s32.totalorder %s3309_s13, 0 }
 0x146   : > { %s2982_s7 = sand.u32 (!%p3310_p0), 1, %s2503_s18   ;;  %p3311_p6 = scmp.ne.s32.totalorder (!%p3310_p0), %s3294_s15, 0 }
 0x147   : > { %506 = sbr.rel (%p3310_p0) target bundleno = 1852 (0x73c), region = 64  ;;  %s2985_s1 = sshll.u32 (!%p3310_p0), %s2982_s7, 2 }
 0x148   : > { %s509_s22 = scalar_lea.sflag (!%p3310_p0), [#allocation7], %s2982_s7  ;;  %s512_s5 = scalar_lea.vmem (!%p3310_p0), [#allocation6], %s2985_s1 }
 0x14e   : > { %2470 = dma.done.wait (%p3311_p6), %s509_s22, 64  }
 0x14f   : > { %2472 = vsyncadd (%p3311_p6), %s509_s22, 4294967232  ;;  %s517_s29 = sand.u32 1, %s2636_s23   ;;  %s521_s21 = scalar_lea.vmem [#allocation9], %s2985_s1 }
 0x150   : > { %s518_s25 = scalar_lea.sflag [#allocation10], %s517_s29 }
 0x151   : > { %2474 = dma.done.wait (%p3311_p6), %s518_s25, 128  }
 0x152   : > { %2476 = vsyncadd (%p3311_p6), %s518_s25, 4294967168  ;;  %s530_s14 = scalar_lea.vmem [#allocation11], %s2985_s1  ;;  %p3312_p7 = scmp.eq.s32.totalorder %s2636_s23, 0 }
 0x154   : > { %2478 = dma.done.wait (%p3312_p7), [#allocation13], 272   ;;  %p3313_p11 = pmov %p3312_p7 }
 0x155   : > { %p3314_p13 = pmov %p3312_p7 }
 0x156   : > { %2480 = vsyncadd (%p3313_p11), [#allocation13], 4294967024 }
 0x157   : > { %2482 = dma.done.wait (%p3314_p13), [#allocation16], 272   ;;  %p3315_p2 = pmov %p3312_p7 }
 0x159   : > { %2484 = vsyncadd (%p3315_p2), [#allocation16], 4294967024  ;;  %p3316_p4 = pmov %p3315_p2 }
 0x15a   : > { %p3317_p8 = pmov %p3315_p2 }
 0x15b   : > { %2486 = dma.done.wait (%p3316_p4), [#allocation19], 272  }
 0x15c   : > { %2488 = vsyncadd (%p3317_p8), [#allocation19], 4294967024  ;;  %p3318_p12 = pmov %p3315_p2 }
 0x15d   : > { %p3319_p9 = pmov %p3315_p2 }
 0x15e   : > { %2490 = dma.done.wait (%p3318_p12), [#allocation22], 144  }
 0x15f   : > { %2492 = vsyncadd (%p3319_p9), [#allocation22], 4294967152  ;;  %v2534_v0 = vmov 0.0   ;;  %vm2535_vm0 = vmmov 0   ;;  %v2072_v1 = vld [vmem:[#allocation12] sm:$0xff]   ;;  %v2073_v2 = vld [vmem:[#allocation15] sm:$0xff]  }
 0x160   : > { %1812 = vmatprep.subr.bf16.mxu0 %v2534_v0  ;;  %1820 = vmatprep.subr.bf16.mxu1 %v2534_v0  ;;  %v2074_v3 = vld [vmem:[#allocation12 + $0x8] sm:$0xff]   ;;  %v2075_v4 = vld [vmem:[#allocation15 + $0x8] sm:$0xff]   ;;  %vm640_vm1 = vcmask 261120   ;;  %v717_v6 = vld [vmem:[%s521_s21] sm:$0xf]  ;;  %vm712_vm2 = vcmask 31744  }
 0x161   : > { %1816 = vmatprep.mubr.msk.bf16.mxu0 %vm2535_vm0, %v2534_v0  ;;  %1824 = vmatprep.mubr.msk.bf16.mxu1 %vm2535_vm0, %v2534_v0  ;;  %v616_v5 = vld [vmem:[%s512_s5] sm:$0xf]  ;;  %713 = vst.msk [vmem:[#allocation5] sm:$0xff] %vm712_vm2, %v2534_v0  ;;  %714 = vst.msk [vmem:[#allocation5 + $0x8] sm:$0xff] %vm712_vm2, %v2534_v0  ;;  %v785_v9 = vld [vmem:[%s530_s14] sm:$0xf] }
 0x162   : > { %1813 = vmatpush3.bf16.msra.mxu0 %v2072_v1  ;;  %1821 = vmatpush3.bf16.msra.mxu1 %v2073_v2  ;;  %715 = vst.msk [vmem:[#allocation5 + $0x10] sm:$0xff] %vm712_vm2, %v2534_v0  ;;  %716 = vst.msk [vmem:[#allocation5 + $0x18] sm:$0xff] %vm712_vm2, %v2534_v0  ;;  %v2076_v7 = vld [vmem:[#allocation18] sm:$0xff]   ;;  %v2077_v8 = vld [vmem:[#allocation18 + $0x8] sm:$0xff]   ;;  %vm698_vm3 = vcmask 27648   ;;  %s2536_s23 = smov 116  }
 0x163   : > { %1814 = vmatprep.subr.bf16.mxu0 %v2534_v0  ;;  %1822 = vmatprep.subr.bf16.mxu1 %v2534_v0  ;;  %v1758_v10 = vld [vmem:[#allocation14] ss:$0 sm:$0xff]  ;;  %v1762_v11 = vld [vmem:[#allocation17] ss:$0 sm:$0xff]  ;;  %s2537_s15 = smov 124   ;;  %s2538_s11 = smov 120  }
 0x164   : > { %v1766_v48 = vld [vmem:[#allocation20] ss:$0 sm:$0xff]  ;;  %vm1198_vm4 = vcmask 1043456   ;;  %vm1073_vm5 = vcmask 64512   ;;  %vm703_vm6 = vcmask 7168   ;;  %v2539_v61 = vmov -inf  }
 0x165   : > { %704 = vst.msk [vmem:[#allocation3] sm:$0xff] %vm703_vm6, %v2539_v61  ;;  %705 = vst.msk [vmem:[#allocation3 + $0x8] sm:$0xff] %vm703_vm6, %v2539_v61  ;;  %v2540_v62 = vmov 0   ;;  %s2541_s28 = smov 4   ;;  %s2542_s0 = smov 8   ;;  %vm1445_vm7 = vcmask 97280  }
 0x166   : > { %1815 = vmatpush3.bf16.msra.mxu0 %v2074_v3  ;;  %1823 = vmatpush3.bf16.msra.mxu1 %v2075_v4  ;;  %706 = vst.msk [vmem:[#allocation3 + $0x10] sm:$0xff] %vm703_vm6, %v2539_v61  ;;  %707 = vst.msk [vmem:[#allocation3 + $0x18] sm:$0xff] %vm703_vm6, %v2539_v61  ;;  %s2543_s26 = smov 12   ;;  %s3320_s24 = sld [smem:[#allocation32_spill]]  ;;  %vm1463_vm8 = vcmask 130048  }
 0x167   : > { %1828 = vmatprep.subr.bf16.mxu0 %v2534_v0  ;;  %1836 = vmatprep.subr.bf16.mxu1 %v2534_v0  ;;  %708 = vst.msk [vmem:[#allocation4] sm:$0xff] %vm703_vm6, %v2534_v0  ;;  %709 = vst.msk [vmem:[#allocation4 + $0x8] sm:$0xff] %vm703_vm6, %v2534_v0  ;;  %s1757_s12 = sshll.u32 %s2982_s7, 3  ;;  %s3321_s22 = sld [smem:[#allocation45_spill]] }
 0x168   : > { %710 = vst.msk [vmem:[#allocation4 + $0x10] sm:$0xff] %vm703_vm6, %v2534_v0  ;;  %711 = vst.msk [vmem:[#allocation4 + $0x18] sm:$0xff] %vm703_vm6, %v2534_v0  ;;  %2070 = vset.pattern.permute.xlu0 %v2540_v62  ;;  %2071 = vset.pattern.permute.xlu1 %v2540_v62  ;;  %s610_s27 = scalar_lea.vmem [#allocation24], %s1757_s12  ;;  %s1509_s25 = scalar_lea.sflag [#allocation8], %s2982_s7 }
 0x169   : > { %1817 = vmatmul.mubr.msk.bf16.vlgmr.msra.gmra.mrb[0].mxu0 %vm640_vm1, %v616_v5  ;;  %1825 = vmatmul.mubr.msk.bf16.vlgmr.msra.gmra.mrb[0].mxu1 %vm640_vm1, %v717_v6  ;;  %s1523_s3 = sshll.u32 %s610_s27, 4  ;;  %p3323_p3 = scmp.ne.s32.totalorder %s3295_s20, 0  ;;  %s3191_s3 = int_to_ptr.vmem [resolvable:$true] %s1523_s3 }
 0x16a   : > { %1832 = vmatprep.mubr.msk.bf16.mxu0 %vm2535_vm0, %v2534_v0  ;;  %1838 = vmatprep.mubr.msk.bf16.mxu1 %vm2535_vm0, %v2534_v0  ;;  %s2417_s21 = scalar_lea.vmem %s3191_s3, 128  ;;  %s2544_s14 = smov [#allocation24]  }
 0x16b   : > { %1829 = vmatpush3.bf16.msra.mxu0 %v2076_v7  ;;  %p2418_p10 = scmp.ne.s32.totalorder %s3191_s3, %s2417_s21 }
 0x16c   : > { %1830 = vmatprep.subr.bf16.mxu0 %v2534_v0  ;;  %s1782_s16 = sshll.u32 %s3320_s24, 7 }
 0x16d   : > { %s3322_s5 = smov %s3321_s22  ;;  %s3189_s29 = scalar_lea.hbm %s3321_s22, %s1782_s16 }
 0x16e   : > { %p2419_p1 = pnand %p2418_p10, %p3323_p3 }
 0x16f   : > { %1831 = vmatpush3.bf16.msra.mxu0 %v2077_v8 }
 0x170   : > { %1842 = vmatprep.subr.bf16.mxu0 %v2534_v0  ;;  %p2420_p5 = pneg %p2419_p1 }
 0x172   : > { %1833 = vmatmul.mubr.msk.bf16.vlgmr.msra.gmra.mrb[4].mxu0 %vm640_vm1, %v785_v9 }
 0x173   : > { %1844 = vmatprep.mubr.msk.bf16.mxu0 %vm2535_vm0, %v2534_v0 }
 0x23c   : > { %v678_v12 = vpop.f32.mrb[0].mxu0  ;;  %v779_v14 = vpop.f32.mrb[0].mxu1 }
 0x23d   : > { %v679_v13 = vadd.f32 %v1758_v10, %v678_v12  ;;  %v1818_v15 = vpop.f32.mrb[1].mxu0  ;;  %v780_v16 = vadd.f32 %v1762_v11, %v779_v14  ;;  %v1826_v17 = vpop.f32.mrb[1].mxu1 }
 0x23e   : > { %v681_v18 = vpop.f32.mrb[2].mxu0  ;;  %v782_v20 = vpop.f32.mrb[2].mxu1  ;;  %v3101_v15 = vld [vmem:[#allocation3] sm:$0xff] }
 0x23f   : > { %v694_v19 = vpack.c.bf16 %v679_v13, %v679_v13  ;;  %v1819_v21 = vpop.f32.mrb[3].mxu0  ;;  %v1827_v22 = vpop.f32.mrb[3].mxu1  ;;  %v2065_v23 = vpack.i.bf16 %v780_v16, %v679_v13  ;;  %v862_v24 = vpack.c.bf16 %v780_v16, %v780_v16 }
 0x240   : > { %v3116_v22 = vld [vmem:[#allocation3 + $0x10] sm:$0xff] }
 0x241   : > { %699 = vst.msk [vmem:[#allocation2] sm:$0xf] %vm698_vm3, %v694_v19  ;;  %2066 = vrot.lane.b32.xlu1 %v2065_v23, %s2536_s23  ;;  %2056 = vrot.lane.b32.xlu0 %v2065_v23, %s2537_s15  ;;  %v889_v25 = vsel %vm712_vm2, %v862_v24, 0  ;;  %v3111_v19 = vld [vmem:[#allocation3 + $0x8] sm:$0xff] }
 0x242   : > { %1837 = vmatpush3.bf16.xpose.msra.mxu1 %v889_v25 }
 0x243   : > { %1848 = vmatprep.subr.bf16.mxu1 %v2534_v0 }
 0x245   : > { %2061 = vrot.lane.b32.xlu0 %v2065_v23, %s2538_s11  ;;  %v846_v49 = vpop.f32.mrb[4].mxu0 }
 0x246   : > { %v3076_v50 = vadd.f32 %v1766_v48, %v846_v49  ;;  %v1834_v51 = vpop.f32.mrb[5].mxu0 }
 0x247   : > { %v849_v52 = vpop.f32.mrb[6].mxu0 }
 0x248   : > { %v880_v26 = vld [vmem:[#allocation2] sm:$0xf]  ;;  %v1835_v53 = vpop.f32.mrb[7].mxu0  ;;  %v876_v54 = vpack.c.bf16 %v3076_v50, %v3076_v50 }
 0x249   : > { %1839 = vmatmul.mubr.msk.bf16.vlgmr.msra.gmra.mrb[4].mxu1 %vm712_vm2, %v880_v26  ;;  %v3126_v26 = vld [vmem:[#allocation3 + $0x18] sm:$0xff] }
 0x24a   : > { %1850 = vmatprep.mubr.msk.bf16.mxu1 %vm2535_vm0, %v2534_v0  ;;  %v1200_v55 = vsel %vm1198_vm4, %v876_v54, 0 }
 0x2b3   : > { %v2067_v27 = vpop.permute.xlu1 %2066  ;;  %v2057_v28 = vpop.permute.xlu0 %2056 }
 0x2b4   : > { %v2068_v29 = vunpack.i.l.bf16 %v2067_v27  ;;  %v2059_v30 = vunpack.i.h.bf16 %v2057_v28  ;;  %v2058_v31 = vunpack.i.l.bf16 %v2057_v28  ;;  %v2069_v36 = vunpack.i.h.bf16 %v2067_v27 }
 0x2b6   : > { %v697_v32 = vpack.c.bf16 %v2068_v29, %v2068_v29  ;;  %v863_v33 = vpack.c.bf16 %v2059_v30, %v2059_v30  ;;  %v695_v34 = vpack.c.bf16 %v2058_v31, %v2058_v31  ;;  %v865_v42 = vpack.c.bf16 %v2069_v36, %v2069_v36 }
 0x2b7   : > { %v2062_v35 = vpop.permute.xlu0 %2061 }
 0x2b8   : > { %702 = vst.msk [vmem:[#allocation2 + $0xc] sm:$0xf] %vm698_vm3, %v697_v32  ;;  %700 = vst.msk [vmem:[#allocation2 + $0x4] sm:$0xf] %vm698_vm3, %v695_v34  ;;  %v2064_v37 = vunpack.i.h.bf16 %v2062_v35  ;;  %v2063_v38 = vunpack.i.l.bf16 %v2062_v35  ;;  %v935_v39 = vsel %vm712_vm2, %v863_v33, 0  ;;  %v1027_v45 = vsel %vm712_vm2, %v865_v42, 0 }
 0x2b9   : > { %1843 = vmatpush3.bf16.xpose.msra.mxu0 %v935_v39 }
 0x2ba   : > { %v864_v40 = vpack.c.bf16 %v2064_v37, %v2064_v37  ;;  %v696_v41 = vpack.c.bf16 %v2063_v38, %v2063_v38  ;;  %1854 = vmatprep.subr.bf16.mxu0 %v2534_v0 }
 0x2bc   : > { %701 = vst.msk [vmem:[#allocation2 + $0x8] sm:$0xf] %vm698_vm3, %v696_v41  ;;  %v981_v43 = vsel %vm712_vm2, %v864_v40, 0 }
 0x2bd   : > { %1849 = vmatpush3.bf16.xpose.msra.mxu1 %v981_v43 }
 0x2be   : > { %1860 = vmatprep.subr.bf16.mxu1 %v2534_v0 }
 0x2bf   : > { %v881_v44 = vld [vmem:[#allocation2 + $0x4] sm:$0xf]  ;;  %v883_v47 = vld [vmem:[#allocation2 + $0xc] sm:$0xf] }
 0x2c0   : > { %1845 = vmatmul.mubr.msk.bf16.vlgmr.msra.gmra.mrb[8].mxu0 %vm712_vm2, %v881_v44 }
 0x2c1   : > { %1855 = vmatpush3.bf16.xpose.msra.mxu0 %v1027_v45  ;;  %1856 = vmatprep.mubr.msk.bf16.mxu0 %vm2535_vm0, %v2534_v0 }
 0x2c2   : > { %1866 = vmatprep.subr.bf16.mxu0 %v2534_v0 }
 0x2c3   : > { %v882_v46 = vld [vmem:[#allocation2 + $0x8] sm:$0xf] }
 0x2c4   : > { %1851 = vmatmul.mubr.msk.bf16.vlgmr.msra.gmra.mrb[8].mxu1 %vm712_vm2, %v882_v46 }
 0x2c5   : > { %1862 = vmatprep.mubr.msk.bf16.mxu1 %vm2535_vm0, %v2534_v0  ;;  %1861 = vmatpush3.bf16.msra.mxu1 %v1200_v55 }
 0x2c6   : > { %1872 = vmatprep.subr.bf16.mxu1 %v2534_v0 }
 0x2c8   : > { %1857 = vmatmul.mubr.msk.bf16.vlgmr.msra.gmra.mrb[12].mxu0 %vm712_vm2, %v883_v47 }
 0x2c9   : > { %1868 = vmatprep.mubr.msk.bf16.mxu0 %vm2535_vm0, %v2534_v0 }
 0x31c   : > { %v3082_v56 = vpop.f32.mrb[4].mxu1 }
 0x31d   : > { %v1840_v57 = vpop.f32.mrb[5].mxu1  ;;  %v1074_v58 = vsel %vm1073_vm5, %v3082_v56, -inf }
 0x31e   : > { %1075 = vmax.xlane.f32.xlu1 %v1074_v58  ;;  %v928_v59 = vpop.f32.mrb[6].mxu1 }
 0x31f   : > { %v1841_v60 = vpop.f32.mrb[7].mxu1 }
 0x393   : > { %v971_v63 = vpop.f32.mrb[8].mxu0 }
 0x394   : > { %v1846_v1 = vpop.f32.mrb[9].mxu0  ;;  %v1077_v2 = vsel %vm1073_vm5, %v971_v63, -inf }
 0x395   : > { %1078 = vmax.xlane.f32.xlu0 %v1077_v2  ;;  %v974_v3 = vpop.f32.mrb[10].mxu0 }
 0x396   : > { %v1847_v4 = vpop.f32.mrb[11].mxu0 }
 0x397   : > { %v1017_v5 = vpop.f32.mrb[8].mxu1 }
 0x398   : > { %v1852_v6 = vpop.f32.mrb[9].mxu1  ;;  %v1080_v7 = vsel %vm1073_vm5, %v1017_v5, -inf }
 0x399   : > { %v1020_v8 = vpop.f32.mrb[10].mxu1  ;;  %1081 = vmax.xlane.f32.xlu0 %v1080_v7 }
 0x39a   : > { %v1853_v9 = vpop.f32.mrb[11].mxu1 }
 0x39b   : > { %v1063_v10 = vpop.f32.mrb[12].mxu0 }
 0x39c   : > { %v1858_v11 = vpop.f32.mrb[13].mxu0  ;;  %v1083_v12 = vsel %vm1073_vm5, %v1063_v10, -inf }
 0x39d   : > { %1084 = vmax.xlane.f32.xlu1 %v1083_v12  ;;  %v1066_v13 = vpop.f32.mrb[14].mxu0  ;;  %v1135_v11 = vld [vmem:[#allocation4 + $0x8] sm:$0xff] }
 0x39e   : > { %v1859_v14 = vpop.f32.mrb[15].mxu0 }
 0x39f   : > { %v1136_v14 = vld [vmem:[#allocation4 + $0x10] sm:$0xff] }
 0x3ab   : > { %v1076_v16 = vpop.xlane.xlu1 %1075 }
 0x3ac   : > { %v3104_v17 = vmax.f32 %v3101_v15, %v1076_v16 }
 0x3ae   : > { %v1090_v18 = vsub.f32 %v3101_v15, %v3104_v17  ;;  %1388 = vst.msk [vmem:[#allocation3] sm:$0xff] %vm703_vm6, %v3104_v17 }
 0x3af   : > { %1104 = vperm.xlu0 %2070, %v3104_v17  }
 0x422   : > { %v1079_v20 = vpop.xlane.xlu0 %1078 }
 0x423   : > { %v3114_v21 = vmax.f32 %v3111_v19, %v1079_v20 }
 0x425   : > { %v1091_v23 = vsub.f32 %v3111_v19, %v3114_v21  ;;  %1389 = vst.msk [vmem:[#allocation3 + $0x8] sm:$0xff] %vm703_vm6, %v3114_v21  ;;  %1109 = vperm.xlu1 %2071, %v3114_v21  }
 0x426   : > { %v1082_v24 = vpop.xlane.xlu0 %1081 }
 0x427   : > { %v3124_v25 = vmax.f32 %v3116_v22, %v1082_v24  ;;  %v1096_v1 = vmul.f32 1.442695, %v1091_v23  ;;  %v1137_v23 = vld [vmem:[#allocation4 + $0x18] sm:$0xff] }
 0x429   : > { %v1092_v27 = vsub.f32 %v3116_v22, %v3124_v25  ;;  %1390 = vst.msk [vmem:[#allocation3 + $0x10] sm:$0xff] %vm703_vm6, %v3124_v25  ;;  %1114 = vperm.xlu1 %2071, %v3124_v25   ;;  %v1134_v22 = vld [vmem:[#allocation4] sm:$0xff] }
 0x42a   : > { %v1085_v28 = vpop.xlane.xlu1 %1084 }
 0x42b   : > { %v1089_v29 = vmax.f32 %v3126_v26, %v1085_v28  ;;  %v1098_v3 = vmul.f32 1.442695, %v1092_v27 }
 0x42d   : > { %v1093_v30 = vsub.f32 %v3126_v26, %v1089_v29  ;;  %1391 = vst.msk [vmem:[#allocation3 + $0x18] sm:$0xff] %vm703_vm6, %v1089_v29  ;;  %1119 = vperm.xlu1 %2071, %v1089_v29  }
 0x42e   : > { %v1105_v31 = vpop.permute.xlu0 %1104 }
 0x42f   : > { %v1122_v32 = vsub.f32 %v3082_v56, %v1105_v31  ;;  %v1100_v2 = vmul.f32 1.442695, %v1093_v30 }
 0x431   : > { %v1126_v33 = vmul.f32 1.442695, %v1122_v32  ;;  %867 = vrot.lane.b32.xlu1 %v3076_v50, %s2537_s15 }
 0x433   : > { %2079 = vpow2.f32 %v1126_v33 }
 0x435   : > { %870 = vrot.lane.b32.xlu1 %v3076_v50, %s2538_s11 }
 0x439   : > { %873 = vrot.lane.b32.xlu1 %v3076_v50, %s2536_s23  ;;  %s2421_s23 = sshll.u32 %s2544_s14, 4  ;;  %s2422_s23 = int_to_ptr.vmem [resolvable:$false] %s2421_s23 }
 0x43a   : > { %s2423_s15 = scalar_lea.vmem %s2422_s23, 256  ;;  %p2424_p0 = scmp.lt.s32.totalorder %s3191_s3, %s2422_s23 }
 0x43b   : > { %p2425_p6 = scmp.lt.s32.totalorder %s2423_s15, %s2417_s21 }
 0x43d   : > { %v2080_v34 = vpop.eup %2079  ;;  %p2426_p7 = por %p2425_p6, %p2424_p0 }
 0x43e   : > { %v1191_v35 = vpack.c.bf16 %v2080_v34, %v2080_v34  ;;  %v1142_v61 = vsel %vm1073_vm5, %v2080_v34, 0.0 }
 0x43f   : > { %p2427_p11 = pnand %p2426_p7, %p2420_p5 }
 0x440   : > { %1863 = vmatmul.mubr.msk.bf16.vlgmr.msra.gmra.mrb[12].mxu1 %vm1073_vm5, %v1191_v35 }
 0x441   : > { %1874 = vmatprep.mubr.msk.bf16.mxu1 %vm2535_vm0, %v2534_v0 }
 0x4a4   : > { %v1110_v36 = vpop.permute.xlu1 %1109 }
 0x4a5   : > { %v1123_v37 = vsub.f32 %v971_v63, %v1110_v36  ;;  %v1164_v36 = vld [vmem:[#allocation5 + $0x8] sm:$0xff] }
 0x4a7   : > { %v1128_v38 = vmul.f32 1.442695, %v1123_v37 }
 0x4a8   : > { %v1115_v39 = vpop.permute.xlu1 %1114 }
 0x4a9   : > { %2081 = vpow2.f32 %v1128_v38  ;;  %v1124_v40 = vsub.f32 %v1017_v5, %v1115_v39  ;;  %v1165_v39 = vld [vmem:[#allocation5 + $0x10] sm:$0xff] }
 0x4ab   : > { %v1130_v41 = vmul.f32 1.442695, %v1124_v40 }
 0x4ac   : > { %v1120_v42 = vpop.permute.xlu1 %1119 }
 0x4ad   : > { %2083 = vpow2.f32 %v1130_v41  ;;  %v1125_v43 = vsub.f32 %v1063_v10, %v1120_v42  ;;  %v1094_v10 = vmul.f32 1.442695, %v1090_v18 }
 0x4af   : > { %v1132_v44 = vmul.f32 1.442695, %v1125_v43 }
 0x4b0   : > { %v868_v45 = vpop.permute.xlu1 %867 }
 0x4b1   : > { %2085 = vpow2.f32 %v1132_v44  ;;  %v877_v46 = vpack.c.bf16 %v868_v45, %v868_v45 }
 0x4b2   : > { %2087 = vpow2.f32 %v1096_v1 }
 0x4b3   : > { %v2082_v47 = vpop.eup %2081  ;;  %v1246_v48 = vsel %vm1198_vm4, %v877_v46, 0  ;;  %2089 = vpow2.f32 %v1100_v2 }
 0x4b4   : > { %1867 = vmatpush3.bf16.msra.mxu0 %v1246_v48  ;;  %v871_v49 = vpop.permute.xlu1 %870  ;;  %v1145_v50 = vsel %vm1073_vm5, %v2082_v47, 0.0  ;;  %v1192_v51 = vpack.c.bf16 %v2082_v47, %v2082_v47  ;;  %2091 = vpow2.f32 %v1098_v3  ;;  %v1166_v47 = vld [vmem:[#allocation5 + $0x18] sm:$0xff] }
 0x4b5   : > { %v878_v52 = vpack.c.bf16 %v871_v49, %v871_v49  ;;  %1146 = vadd.xlane.f32.xlu1 %v1145_v50  ;;  %1878 = vmatprep.subr.bf16.mxu0 %v2534_v0  ;;  %2093 = vpow2.f32 %v1094_v10 }
 0x4b7   : > { %v2084_v53 = vpop.eup %2083  ;;  %v1292_v54 = vsel %vm1198_vm4, %v878_v52, 0  ;;  %1869 = vmatmul.mubr.msk.bf16.vlgmr.msra.gmra.mrb[16].mxu0 %vm1073_vm5, %v1192_v51 }
 0x4b8   : > { %1873 = vmatpush3.bf16.msra.mxu1 %v1292_v54  ;;  %v874_v55 = vpop.permute.xlu1 %873  ;;  %v1148_v56 = vsel %vm1073_vm5, %v2084_v53, 0.0  ;;  %v1193_v57 = vpack.c.bf16 %v2084_v53, %v2084_v53  ;;  %1880 = vmatprep.mubr.msk.bf16.mxu0 %vm2535_vm0, %v2534_v0 }
 0x4b9   : > { %v879_v58 = vpack.c.bf16 %v874_v55, %v874_v55  ;;  %1149 = vadd.xlane.f32.xlu0 %v1148_v56  ;;  %1884 = vmatprep.subr.bf16.mxu1 %v2534_v0 }
 0x4bb   : > { %v2086_v59 = vpop.eup %2085  ;;  %v1338_v60 = vsel %vm1198_vm4, %v879_v58, 0  ;;  %1875 = vmatmul.mubr.msk.bf16.vlgmr.msra.gmra.mrb[16].mxu1 %vm1073_vm5, %v1193_v57 }
 0x4bc   : > { %1879 = vmatpush3.bf16.msra.mxu0 %v1338_v60  ;;  %v1151_v62 = vsel %vm1073_vm5, %v2086_v59, 0.0  ;;  %v1194_v63 = vpack.c.bf16 %v2086_v59, %v2086_v59  ;;  %1886 = vmatprep.mubr.msk.bf16.mxu1 %vm2535_vm0, %v2534_v0  ;;  %v2088_v4 = vpop.eup %2087  ;;  %v2078_v60 = vld [vmem:[#allocation21] sm:$0xff]  }
 0x4bd   : > { %1143 = vadd.xlane.f32.xlu0 %v1142_v61  ;;  %1152 = vadd.xlane.f32.xlu1 %v1151_v62  ;;  %v2090_v5 = vpop.eup %2089  ;;  %v1139_v12 = vmul.f32 %v2088_v4, %v1135_v11 }
 0x4be   : > { %v2092_v0 = vpop.eup %2091  ;;  %v1141_v26 = vmul.f32 %v2090_v5, %v1137_v23  ;;  %1885 = vmatpush3.bf16.msra.mxu1 %v2078_v60  ;;  %v1778_v23 = vld [vmem:[#allocation23] ss:$0 sm:$0xff] }
 0x4bf   : > { %1881 = vmatmul.mubr.msk.bf16.vlgmr.msra.gmra.mrb[20].mxu0 %vm1073_vm5, %v1194_v63  ;;  %v1140_v19 = vmul.f32 %v2092_v0, %v1136_v14  ;;  %v2094_v20 = vpop.eup %2093 }
 0x4c0   : > { %v1138_v25 = vmul.f32 %v2094_v20, %v1134_v22 }
 0x4ce   : > { %1174 = vperm.xlu1 %2071, %v2088_v4   ;;  %v1163_v4 = vld [vmem:[#allocation5] sm:$0xff] }
 0x4d2   : > { %1184 = vperm.xlu1 %2071, %v2090_v5  }
 0x4d3   : > { %1179 = vperm.xlu0 %2070, %v2092_v0  }
 0x513   : > { %v3168_v6 = vpop.f32.mrb[12].mxu1 }
 0x514   : > { %v1864_v7 = vpop.f32.mrb[13].mxu1 }
 0x515   : > { %v1239_v8 = vpop.f32.mrb[14].mxu1 }
 0x516   : > { %v1865_v9 = vpop.f32.mrb[15].mxu1 }
 0x542   : > { %v1147_v13 = vpop.xlane.xlu1 %1146 }
 0x543   : > { %v1155_v16 = vadd.f32 %v1147_v13, %v1139_v12 }
 0x545   : > { %1160 = vst.msk [vmem:[#allocation4 + $0x8] sm:$0xff] %vm703_vm6, %v1155_v16 }
 0x546   : > { %v1150_v21 = vpop.xlane.xlu0 %1149 }
 0x547   : > { %v1156_v24 = vadd.f32 %v1150_v21, %v1140_v19 }
 0x549   : > { %1161 = vst.msk [vmem:[#allocation4 + $0x10] sm:$0xff] %vm703_vm6, %v1156_v24 }
 0x54a   : > { %v1144_v15 = vpop.xlane.xlu0 %1143  ;;  %v1153_v17 = vpop.xlane.xlu1 %1152 }
 0x54b   : > { %v1154_v18 = vadd.f32 %v1144_v15, %v1138_v25  ;;  %v1157_v27 = vadd.f32 %v1153_v17, %v1141_v26 }
 0x54c   : > { %v1400_v28 = vld [vmem:[#allocation4 + $0x8] sm:$0xff] }
 0x54d   : > { %1159 = vst.msk [vmem:[#allocation4] sm:$0xff] %vm703_vm6, %v1154_v18  ;;  %1162 = vst.msk [vmem:[#allocation4 + $0x18] sm:$0xff] %vm703_vm6, %v1157_v27  ;;  %2095 = vrcp.f32 %v1400_v28 }
 0x54e   : > { %v1175_v37 = vpop.permute.xlu1 %1174 }
 0x54f   : > { %v1188_v38 = vmul.f32 %v1175_v37, %v1164_v36 }
 0x550   : > { %v1401_v29 = vld [vmem:[#allocation4 + $0x10] sm:$0xff] }
 0x551   : > { %2097 = vrcp.f32 %v1401_v29 }
 0x552   : > { %v1180_v40 = vpop.permute.xlu0 %1179  ;;  %v1185_v48 = vpop.permute.xlu1 %1184 }
 0x553   : > { %v1189_v45 = vmul.f32 %v1180_v40, %v1165_v39  ;;  %v1190_v53 = vmul.f32 %v1185_v48, %v1166_v47 }
 0x554   : > { %v1402_v30 = vld [vmem:[#allocation4 + $0x18] sm:$0xff]  ;;  %v1399_v31 = vld [vmem:[#allocation4] sm:$0xff] }
 0x555   : > { %2099 = vrcp.f32 %v1402_v30 }
 0x556   : > { %2101 = vrcp.f32 %v1399_v31 }
 0x557   : > { %v2096_v32 = vpop.eup %2095 }
 0x558   : > { %1414 = vperm.xlu1 %2071, %v2096_v32  }
 0x55b   : > { %v2098_v33 = vpop.eup %2097 }
 0x55c   : > { %1419 = vperm.xlu0 %2070, %v2098_v33  }
 0x55f   : > { %v2100_v34 = vpop.eup %2099 }
 0x560   : > { %1169 = vperm.xlu0 %2070, %v2094_v20   ;;  %1424 = vperm.xlu1 %2071, %v2100_v34   ;;  %v2102_v35 = vpop.eup %2101 }
 0x564   : > { %1409 = vperm.xlu1 %2071, %v2102_v35  }
 0x58a   : > { %v1282_v41 = vpop.f32.mrb[16].mxu0 }
 0x58b   : > { %v1381_v42 = vadd.f32 %v1282_v41, %v1188_v38  ;;  %v1870_v43 = vpop.f32.mrb[17].mxu0 }
 0x58c   : > { %v1285_v44 = vpop.f32.mrb[18].mxu0 }
 0x58d   : > { %1385 = vst.msk [vmem:[#allocation5 + $0x8] sm:$0xff] %vm712_vm2, %v1381_v42  ;;  %v1871_v46 = vpop.f32.mrb[19].mxu0 }
 0x58e   : > { %v1328_v49 = vpop.f32.mrb[16].mxu1 }
 0x58f   : > { %v1382_v50 = vadd.f32 %v1328_v49, %v1189_v45  ;;  %v1876_v51 = vpop.f32.mrb[17].mxu1 }
 0x590   : > { %v1331_v52 = vpop.f32.mrb[18].mxu1 }
 0x591   : > { %1386 = vst.msk [vmem:[#allocation5 + $0x10] sm:$0xff] %vm712_vm2, %v1382_v50  ;;  %v1877_v54 = vpop.f32.mrb[19].mxu1 }
 0x592   : > { %v1374_v55 = vpop.f32.mrb[20].mxu0 }
 0x593   : > { %v1383_v56 = vadd.f32 %v1374_v55, %v1190_v53  ;;  %v1882_v57 = vpop.f32.mrb[21].mxu0 }
 0x594   : > { %v1377_v58 = vpop.f32.mrb[22].mxu0  ;;  %v1396_v62 = vld [vmem:[#allocation5 + $0x8] sm:$0xff] }
 0x595   : > { %1387 = vst.msk [vmem:[#allocation5 + $0x18] sm:$0xff] %vm712_vm2, %v1383_v56  ;;  %v1883_v59 = vpop.f32.mrb[23].mxu0 }
 0x598   : > { %v1397_v2 = vld [vmem:[#allocation5 + $0x10] sm:$0xff] }
 0x59c   : > { %v1398_v7 = vld [vmem:[#allocation5 + $0x18] sm:$0xff] }
 0x5d7   : > { %v1415_v61 = vpop.permute.xlu1 %1414 }
 0x5d8   : > { %v1428_v63 = vmul.f32 %v1415_v61, %v1396_v62 }
 0x5da   : > { %1432 = vrot.lane.b32.xlu0 %v1428_v63, %s2541_s28 }
 0x5db   : > { %v1420_v1 = vpop.permute.xlu0 %1419 }
 0x5dc   : > { %v1429_v3 = vmul.f32 %v1420_v1, %v1397_v2 }
 0x5de   : > { %1436 = vrot.lane.b32.xlu1 %v1429_v3, %s2542_s0 }
 0x5df   : > { %v1170_v5 = vpop.permute.xlu0 %1169  ;;  %v1425_v0 = vpop.permute.xlu1 %1424 }
 0x5e0   : > { %v1187_v8 = vmul.f32 %v1170_v5, %v1163_v4  ;;  %v1430_v9 = vmul.f32 %v1425_v0, %v1398_v7 }
 0x5e2   : > { %v1380_v10 = vadd.f32 %v3168_v6, %v1187_v8  ;;  %1440 = vrot.lane.b32.xlu0 %v1430_v9, %s2543_s26 }
 0x5e3   : > { %v1410_v11 = vpop.permute.xlu1 %1409 }
 0x5e4   : > { %1384 = vst.msk [vmem:[#allocation5] sm:$0xff] %vm712_vm2, %v1380_v10 }
 0x5eb   : > { %v1395_v12 = vld [vmem:[#allocation5] sm:$0xff] }
 0x5ec   : > { %v1427_v14 = vmul.f32 %v1410_v11, %v1395_v12 }
 0x64c   : > { %v1433_v13 = vpop.permute.xlu0 %1432 }
 0x64d   : > { %v1443_v19 = vsel %vm712_vm2, %v1427_v14, %v1433_v13 }
 0x650   : > { %v1437_v16 = vpop.permute.xlu1 %1436 }
 0x651   : > { %v1444_v20 = vsel %vm1073_vm5, %v1443_v19, %v1437_v16 }
 0x654   : > { %v1441_v21 = vpop.permute.xlu0 %1440 }
 0x655   : > { %v1446_v22 = vsel %vm1445_vm7, %v1444_v20, %v1441_v21 }
 0x656   : > { %v1447_v6 = vpack.c.bf16 %v1446_v22, %v1446_v22 }
 0x658   : > { %1887 = vmatmul.mubr.msk.bf16.vlgmr.msra.gmra.mrb[20].mxu1 %vm1463_vm8, %v1447_v6 }
 0x72b   : > { %v1501_v24 = vpop.f32.mrb[20].mxu1 }
 0x72c   : > { %v1502_v25 = vadd.f32 %v1778_v23, %v1501_v24  ;;  %v1888_v26 = vpop.f32.mrb[21].mxu1 }
 0x72d   : > { %v1504_v15 = vpop.f32.mrb[22].mxu1 }
 0x72e   : > { %v1889_v17 = vpop.f32.mrb[23].mxu1  ;;  %1507 = vst.msk [vmem:[%s610_s27] sm:$0xff] %vm640_vm1, %v1502_v25 }
 0x72f   : > { %2430 = shalt.err (!%p2427_p11)
}
 0x730   : > { %s2431_s7 = scalar_lea.hbm %s3189_s29, 128  ;;  %s2435_s0 = scalar_lea.hbm %s3322_s5, 256 }
 0x731   : > { %p2432_p13 = scmp.ne.s32.totalorder %s3189_s29, %s2431_s7  ;;  %p2436_p8 = scmp.lt.u32.totalorder %s3189_s29, %s3322_s5 }
 0x732   : > { %p2437_p12 = scmp.lt.u32.totalorder %s2435_s0, %s2431_s7  ;;  %p2439_p10 = scmp.lt.u32.totalorder %s2431_s7, %s3189_s29 }
 0x733   : > { %p2433_p2 = pnand %p2432_p13, %p3323_p3 }
 0x734   : > { %p2438_p9 = por %p2437_p12, %p2436_p8 }
 0x735   : > { %p2434_p4 = pneg %p2433_p2 }
 0x736   : > { %p2440_p1 = por %p2439_p10, %p2438_p9 }
 0x738   : > { %p2441_p5 = pnand %p2440_p1, %p2434_p4 }
 0x73a   : > { %2444 = shalt.err (!%p2441_p5)
}
 0x73b   : > { %1928 = dma.vmem_to_hbm [thread:$0]  (%p3323_p3), %s3191_s3, 128, %s3189_s29, %s1509_s25  }
 0x73c PF: > { %s3324_s12 = sld [smem:[#allocation34_spill]]  ;;  %s1535_s16 = sand.u32 1, %s2499_s17  }
 0x73d   : > { %p3325_p0 = scmp.ne.s32.totalorder %s3297_s30, 0  ;;  %s1536_s27 = scalar_lea.sflag [#allocation8], %s1535_s16 }
 0x742   : > { %p3326_p6 = scmp.ge.s32.totalorder %s3324_s12, 2 }
 0x744   : > { %p1966_p7 = pnand %p3326_p6, %p3325_p0 }
 0x746   : > { %2494 = dma.done.wait (!%p1966_p7), %s1536_s27, 128  }
 0x747   : > { %2496 = vsyncadd (!%p1966_p7), %s1536_s27, 4294967168  ;;  %s34_s22 = sadd.s32 1, %s3324_s12   ;;  %s3327_s20 = sld [smem:[#allocation37_spill]] }
 0x748   : > { %p31_p11 = scmp.ge.s32.totalorder %s34_s22, 4   ;;  %s3328_s13 = sld [smem:[#allocation33_spill]] }
 0x749   : > { %s3329_s21 = sld [smem:[#allocation36_spill]]  ;;  %s3330_s17 = smov %s2503_s18 }
 0x74a   : > { %s3331_s18 = smov %s2507_s19  ;;  %33 = sbr.rel (!%p31_p11) target bundleno = 21 (0x15), region = 173 }
 0x74d   : > { %s3332_s19 = smov %s3327_s20 }
 0x74e   : > { %s3333_s20 = smov %s3328_s13 }
 0x751   :  { %1541 = vsyncpa [#allocation7], 1 }
 0x752   :  { %1543 = vsyncpa [#allocation7 + $0x1], 1 }
 0x753   :  { %1544 = vsyncpa [#allocation10], 1 }
 0x754   :  { %1546 = vsyncpa [#allocation10 + $0x1], 1 }
 0x755   :  { %1547 = vsyncpa [#allocation13], 1 }
 0x756   :  { %1548 = vsyncpa [#allocation16], 1 }
 0x757   :  { %1549 = vsyncpa [#allocation19], 1 }
 0x758   :  { %1550 = vsyncpa [#allocation22], 1 }
 0x759   :  { %1551 = vsyncpa [#allocation8], 1 }
 0x75a   :  { %1553 = vsyncpa [#allocation8 + $0x1], 1 }

</bundles_post_ra>
